<compile_context>
chip_gen: v7x
topology: tpu7x:2x2x1
jax: 0.10.0
libtpu: 0.0.40
codegen_flags: <defaults>
</compile_context>

<pallas_src>
import numpy as np
import jax
import jax.numpy as jnp
from jax import lax
from jax.experimental import pallas as pl
from jax.experimental.pallas import tpu as pltpu

MID_CHANNEL = 256
POSDIM = 128
OUT_PAD = 128          # final-layer output padded to a full lane width
ROW_TILE_MAX = 256     # rows per grid step (bounds per-step VMEM on v7x)
OUTER_TILE_I = 8       # i-rows per grid step in the outer-product kernel
VMEM_LIMIT = 32 * 1024 * 1024


def _round_up(a, b):
    return (a + b - 1) // b * b


def _row_tiling(n):
    n_pad = _round_up(max(n, 1), 8)
    tile_n = min(n_pad, ROW_TILE_MAX)
    n_pad = _round_up(n_pad, tile_n)
    return n_pad, tile_n


def _stack_coords(x, n_pad):
    # (N, 3) -> (3, n_pad, 1) per-net coordinate columns, rows zero-padded.
    n = x.shape[0]
    return jnp.zeros((3, n_pad, 1), jnp.float32).at[:, :n, 0].set(x.T)


def _leaky_relu(z):
    # leaky_relu(z, 0.2) == max(z, 0.2*z) for all z.
    return jnp.maximum(z, 0.2 * z)


# ---------------------------------------------------------------------------
# Kernel 1: fused Fourier encoding + 5-layer MLP for all three nets
#           grid = (net, row_tile); per-net weights selected by the net axis.
# ---------------------------------------------------------------------------
def _nets_kernel(x_ref, bfreq_ref, phase_ref,
                 w1_ref, b1_ref, w2_ref, b2_ref, w3_ref, b3_ref,
                 w4_ref, b4_ref, w5_ref, b5_ref, out_ref):
    # GaussianEncoding [cos(2*pi*x@B^T), sin(2*pi*x@B^T)] as a single
    # phase-shifted sin over a duplicated frequency row (VPU + EUP only).
    h = jnp.sin(x_ref[...] * bfreq_ref[...] + phase_ref[...])      # (tile_n, 128)

    for w_ref, b_ref in ((w1_ref, b1_ref), (w2_ref, b2_ref),
                         (w3_ref, b3_ref), (w4_ref, b4_ref)):
        z = jnp.dot(h, w_ref[...], preferred_element_type=jnp.float32) + b_ref[...]
        h = _leaky_relu(z)                                          # LeakyReLU(0.2)

    # Final Linear; output padded to 128 lanes -> unmasked lane-dense store.
    out_ref[...] = jnp.dot(h, w5_ref[...],
                           preferred_element_type=jnp.float32) + b5_ref[...]


def run_nets(x, p):
    """x: (N, 3). Returns padded factors of shape (3, n_pad, OUT_PAD)."""
    n = x.shape[0]
    n_pad, tile_n = _row_tiling(n)
    xs = _stack_coords(x, n_pad)

    def wspec(shape):  # stacked weight/bias: one net's slice resident per step
        return pl.BlockSpec((None,) + tuple(shape[1:]), lambda net, i: (net, 0, 0))

    in_specs = [
        pl.BlockSpec((None, tile_n, 1), lambda net, i: (net, i, 0)),   # x column
        pl.BlockSpec((1, POSDIM), lambda net, i: (0, 0)),              # frequencies
        pl.BlockSpec((1, POSDIM), lambda net, i: (0, 0)),              # phases
    ]
    args = [xs, p["bfreq"], p["phase"]]
    for w, b in p["layers"]:
        in_specs += [wspec(w.shape), wspec(b.shape)]
        args += [w, b]

    return pl.pallas_call(
        _nets_kernel,
        out_shape=jax.ShapeDtypeStruct((3, n_pad, OUT_PAD), jnp.float32),
        grid=(3, n_pad // tile_n),          # nets slow, row tiles fast
        in_specs=in_specs,
        out_specs=pl.BlockSpec((None, tile_n, OUT_PAD), lambda net, i: (net, i, 0)),
        compiler_params=pltpu.CompilerParams(
            dimension_semantics=("parallel", "parallel"),
            vmem_limit_bytes=VMEM_LIMIT),
    )(*args)


# ---------------------------------------------------------------------------
# Kernel 2 (flag == 1): encoding + all three nets + einsum('nr,nr,nr->n'),
#           fully fused so U/V/W never hit HBM.
# ---------------------------------------------------------------------------
def _nets_diag_kernel(x_ref, bfreq_ref, phase_ref,
                      w1_ref, b1_ref, w2_ref, b2_ref, w3_ref, b3_ref,
                      w4_ref, b4_ref, w5_ref, b5_ref, out_ref):
    bfreq = bfreq_ref[...]
    phase = phase_ref[...]

    def one_net(c):                                    # c = net index = x column
        h = jnp.sin(x_ref[c] * bfreq + phase)          # (tile_n, 128)
        for w_ref, b_ref in ((w1_ref, b1_ref), (w2_ref, b2_ref),
                             (w3_ref, b3_ref), (w4_ref, b4_ref)):
            z = jnp.dot(h, w_ref[c], preferred_element_type=jnp.float32) + b_ref[c]
            h = _leaky_relu(z)
        return jnp.dot(h, w5_ref[c], preferred_element_type=jnp.float32) + b5_ref[c]

    # Padded rank lanes of every factor are exactly zero, so the 128-lane
    # product/sum equals the true rank-R contraction.
    prod = one_net(0) * one_net(1) * one_net(2)
    out_ref[...] = jnp.sum(prod, axis=-1, keepdims=True)


def run_nets_diag(x, p):
    n = x.shape[0]
    n_pad, tile_n = _row_tiling(n)
    xs = _stack_coords(x, n_pad)

    def wspec(shape):  # full stacked weights resident (~3 MiB total)
        return pl.BlockSpec(tuple(shape), lambda i, _s=len(shape): (0,) * _s)

    in_specs = [
        pl.BlockSpec((3, tile_n, 1), lambda i: (0, i, 0)),
        pl.BlockSpec((1, POSDIM), lambda i: (0, 0)),
        pl.BlockSpec((1, POSDIM), lambda i: (0, 0)),
    ]
    args = [xs, p["bfreq"], p["phase"]]
    for w, b in p["layers"]:
        in_specs += [wspec(w.shape), wspec(b.shape)]
        args += [w, b]

    out = pl.pallas_call(
        _nets_diag_kernel,
        out_shape=jax.ShapeDtypeStruct((n_pad, 1), jnp.float32),
        grid=(n_pad // tile_n,),
        in_specs=in_specs,
        out_specs=pl.BlockSpec((tile_n, 1), lambda i: (i, 0)),
        compiler_params=pltpu.CompilerParams(
            dimension_semantics=("parallel",),
            vmem_limit_bytes=VMEM_LIMIT),
    )(*args)
    return out[:n, 0]


# ---------------------------------------------------------------------------
# Kernel 3 (flag == 2/3): einsum('ir,jr,kr->ijk'), tiled over i.
# ---------------------------------------------------------------------------
def _outer_kernel(u_ref, v_ref, w_ref, out_ref):
    v = v_ref[...]                                        # (N, Rp)
    w = w_ref[...]                                        # (N, Rp)
    for a in range(u_ref.shape[0]):                       # static, == OUTER_TILE_I
        scaled = v * u_ref[a:a + 1, :]                    # (N, Rp)
        # contract dim 1 of both operands -> MXU directly, no in-kernel transpose
        out_ref[a, :, :] = lax.dot_general(
            scaled, w, (((1,), (1,)), ((), ())),
            preferred_element_type=jnp.float32)           # (N, N)


def run_outer(u, v, w):
    """u: (Ni, Rp) rows may include zero padding; v, w: (N, Rp). -> (Ni, N, N)."""
    ni, rp = u.shape
    n = v.shape[0]
    ni_pad = _round_up(ni, OUTER_TILE_I)
    if ni_pad != ni:
        u = jnp.zeros((ni_pad, rp), u.dtype).at[:ni].set(u)
    # TODO(synk): for very large N also tile the j/k axes so the (TILE_I, N, N)
    # slab stays small; not needed at these sizes.
    out = pl.pallas_call(
        _outer_kernel,
        out_shape=jax.ShapeDtypeStruct((ni_pad, n, n), jnp.float32),
        grid=(ni_pad // OUTER_TILE_I,),
        in_specs=[
            pl.BlockSpec((OUTER_TILE_I, rp), lambda i: (i, 0)),
            pl.BlockSpec((n, rp), lambda i: (0, 0)),
            pl.BlockSpec((n, rp), lambda i: (0, 0)),
        ],
        out_specs=pl.BlockSpec((OUTER_TILE_I, n, n), lambda i: (i, 0, 0)),
        compiler_params=pltpu.CompilerParams(
            dimension_semantics=("parallel",),
            vmem_limit_bytes=VMEM_LIMIT),
    )(u, v, w)
    return out[:ni]


# ---------------------------------------------------------------------------
# Parameter construction (mirrors the PyTorch inits) + packing for the kernels
# ---------------------------------------------------------------------------
def init_linear(key, fan_in, fan_out, *, first=False, plain=False):
    kw, kb = jax.random.split(key)
    if first:                       # MLPLayer(is_first=True): U(-1/in, 1/in)
        bound = 1.0 / fan_in
    elif plain:                     # final nn.Linear default
        bound = 1.0 / np.sqrt(fan_in)
    else:                           # xavier_uniform w/ leaky_relu(0.2) gain
        gain = np.sqrt(2.0 / (1.0 + 0.2 ** 2))
        bound = gain * np.sqrt(6.0 / (fan_in + fan_out))
    w = jax.random.uniform(kw, (fan_out, fan_in), jnp.float32, -bound, bound)
    bbound = 1.0 / np.sqrt(fan_in)
    b = jax.random.uniform(kb, (fan_out,), jnp.float32, -bbound, bbound)
    return w.T, b.reshape(1, fan_out)      # stored as (in, out) / (1, out)


def init_net_params(key, rank):
    keys = jax.random.split(key, 5)
    return [
        init_linear(keys[0], POSDIM, MID_CHANNEL, first=True),
        init_linear(keys[1], MID_CHANNEL, MID_CHANNEL),
        init_linear(keys[2], MID_CHANNEL, MID_CHANNEL),
        init_linear(keys[3], MID_CHANNEL, MID_CHANNEL),
        init_linear(keys[4], MID_CHANNEL, rank, plain=True),
    ]


def prepare_packed_params(enc_b, params_u, params_v, params_w, rank):
    """Stack the three nets (leading axis 3), pad the final layer to OUT_PAD
    lanes, and build the fused Fourier frequency/phase rows."""
    assert rank <= OUT_PAD
    b_row = enc_b.reshape(1, POSDIM // 2)                               # B^T
    bfreq = 2.0 * jnp.pi * jnp.concatenate([b_row, b_row], axis=1)      # (1, 128)
    phase = jnp.concatenate(
        [jnp.full((1, POSDIM // 2), 0.5 * jnp.pi, jnp.float32),         # cos half
         jnp.zeros((1, POSDIM // 2), jnp.float32)], axis=1)             # sin half

    layers = []
    for li in range(5):
        ws = jnp.stack([p[li][0] for p in (params_u, params_v, params_w)])
        bs = jnp.stack([p[li][1] for p in (params_u, params_v, params_w)])
        if li == 4:   # zero-pad rank -> OUT_PAD for lane-dense final store
            ws = jnp.pad(ws, ((0, 0), (0, 0), (0, OUT_PAD - rank)))
            bs = jnp.pad(bs, ((0, 0), (0, 0), (0, OUT_PAD - rank)))
        layers.append((ws, bs))
    return {"bfreq": bfreq, "phase": phase, "layers": layers, "rank": rank}


# ---------------------------------------------------------------------------
# Full Network.forward
# ---------------------------------------------------------------------------
def network_forward(x, flag, packed):
    n = x.shape[0]
    rank = packed["rank"]
    if flag == 1:
        return run_nets_diag(x, packed)                       # (n,)
    if flag not in (2, 3):
        raise NotImplementedError
    raw = run_nets(x, packed)                                 # (3, n_pad, 128)
    # padded lanes are zero, so the 128-wide factors give the exact tensor;
    # padded rows of U only add rows that are sliced off below.
    full = run_outer(raw[0], raw[1, :n], raw[2, :n])[:n]      # (n, n, n)
    if flag == 2:
        return full
    U = raw[0, :n, :rank]
    V = raw[1, :n, :rank]
    W = raw[2, :n, :rank]
    return full, U, V, W


# ---------------------------------------------------------------------------
# Pure-JAX reference (for correctness check only)
# ---------------------------------------------------------------------------
def reference_forward(x, flag, enc_b, params_u, params_v, params_w):
    def net(col, params):
        v = 2.0 * jnp.pi * col @ enc_b.T
        h = jnp.concatenate([jnp.cos(v), jnp.sin(v)], axis=-1)
        for i, (w, b) in enumerate(params):
            h = h @ w + b
            if i < len(params) - 1:
                h = jnp.where(h >= 0, h, 0.2 * h)
        return h

    U = net(x[:, 0:1], params_u)
    V = net(x[:, 1:2], params_v)
    W = net(x[:, 2:3], params_w)
    if flag == 1:
        return jnp.einsum('nr,nr,nr->n', U, V, W)
    return jnp.einsum('ir,jr,kr->ijk', U, V, W), U, V, W


if __name__ == "__main__":
    N = 8        # number of coordinate samples
    RANK = 8

    root = jax.random.PRNGKey(0)
    k_x, k_b, k_u, k_v, k_w = jax.random.split(root, 5)

    x = jax.random.normal(k_x, (N, 3), jnp.float32)
    enc_b = 8.0 * jax.random.normal(k_b, (POSDIM // 2, 1), jnp.float32)  # sigma=8
    params_u = init_net_params(k_u, RANK)
    params_v = init_net_params(k_v, RANK)
    params_w = init_net_params(k_w, RANK)
    packed = prepare_packed_params(enc_b, params_u, params_v, params_w, RANK)

    # flag == 3: full tensor + factors; flag == 1: per-sample contraction
    out3, U, V, W = network_forward(x, 3, packed)
    out1 = network_forward(x, 1, packed)
    jax.block_until_ready((out3, U, V, W, out1))

    ref3, refU, refV, refW = reference_forward(x, 3, enc_b, params_u, params_v, params_w)
    ref1 = reference_forward(x, 1, enc_b, params_u, params_v, params_w)

    assert out3.shape == (N, N, N) and U.shape == (N, RANK) and out1.shape == (N,)
    # tolerances leave headroom for MXU f32 precision differences between the
    # Pallas dots and XLA's reference matmuls.
    tol = dict(rtol=5e-3, atol=2e-4)
    np.testing.assert_allclose(np.asarray(U), np.asarray(refU), **tol)
    np.testing.assert_allclose(np.asarray(V), np.asarray(refV), **tol)
    np.testing.assert_allclose(np.asarray(W), np.asarray(refW), **tol)
    np.testing.assert_allclose(np.asarray(out3), np.asarray(ref3), **tol)
    np.testing.assert_allclose(np.asarray(out1), np.asarray(ref1), **tol)

    print("KERNEL_OK")
</pallas_src>

<mosaic_0001>
module attributes {stable_mosaic.version = 11 : i64} {
  func.func @_nets_kernel(%arg0: i32, %arg1: i32, %arg2: memref<1x8x1xf32, #tpu.memory_space<vmem>>, %arg3: memref<1x128xf32, #tpu.memory_space<vmem>>, %arg4: memref<1x128xf32, #tpu.memory_space<vmem>>, %arg5: memref<1x128x256xf32, #tpu.memory_space<vmem>>, %arg6: memref<1x1x256xf32, #tpu.memory_space<vmem>>, %arg7: memref<1x256x256xf32, #tpu.memory_space<vmem>>, %arg8: memref<1x1x256xf32, #tpu.memory_space<vmem>>, %arg9: memref<1x256x256xf32, #tpu.memory_space<vmem>>, %arg10: memref<1x1x256xf32, #tpu.memory_space<vmem>>, %arg11: memref<1x256x256xf32, #tpu.memory_space<vmem>>, %arg12: memref<1x1x256xf32, #tpu.memory_space<vmem>>, %arg13: memref<1x256x128xf32, #tpu.memory_space<vmem>>, %arg14: memref<1x1x128xf32, #tpu.memory_space<vmem>>, %arg15: memref<1x8x128xf32, #tpu.memory_space<vmem>>) attributes {dimension_semantics = [#tpu.dimension_semantics<parallel>, #tpu.dimension_semantics<parallel>], iteration_bounds = array<i64: 3, 1>, scalar_prefetch = 0 : i64, scratch_operands = 0 : i64, tpu.core_type = #tpu.core_type<tc>, window_params = [{transform_indices = @transform_0, window_bounds = array<i64: 1, 8, 1>}, {pipeline_mode = #tpu.pipeline_mode<synchronous>, transform_indices = @transform_1, window_bounds = array<i64: 1, 128>}, {pipeline_mode = #tpu.pipeline_mode<synchronous>, transform_indices = @transform_2, window_bounds = array<i64: 1, 128>}, {transform_indices = @transform_3, window_bounds = array<i64: 1, 128, 256>}, {transform_indices = @transform_4, window_bounds = array<i64: 1, 1, 256>}, {transform_indices = @transform_5, window_bounds = array<i64: 1, 256, 256>}, {transform_indices = @transform_6, window_bounds = array<i64: 1, 1, 256>}, {transform_indices = @transform_7, window_bounds = array<i64: 1, 256, 256>}, {transform_indices = @transform_8, window_bounds = array<i64: 1, 1, 256>}, {transform_indices = @transform_9, window_bounds = array<i64: 1, 256, 256>}, {transform_indices = @transform_10, window_bounds = array<i64: 1, 1, 256>}, {transform_indices = @transform_11, window_bounds = array<i64: 1, 256, 128>}, {transform_indices = @transform_12, window_bounds = array<i64: 1, 1, 128>}, {transform_indices = @transform_13, window_bounds = array<i64: 1, 8, 128>}]} {
    %c0 = arith.constant 0 : index
    %c0_0 = arith.constant 0 : index
    %c0_1 = arith.constant 0 : index
    %0 = vector.load %arg2[%c0, %c0_0, %c0_1] : memref<1x8x1xf32, #tpu.memory_space<vmem>>, vector<1x8x1xf32>
    %1 = vector.shape_cast %0 : vector<1x8x1xf32> to vector<8x1xf32>
    %c0_2 = arith.constant 0 : index
    %c0_3 = arith.constant 0 : index
    %2 = vector.load %arg3[%c0_2, %c0_3] : memref<1x128xf32, #tpu.memory_space<vmem>>, vector<1x128xf32>
    %3 = vector.broadcast %1 : vector<8x1xf32> to vector<8x128xf32>
    %4 = vector.broadcast %2 : vector<1x128xf32> to vector<8x128xf32>
    %5 = arith.mulf %3, %4 : vector<8x128xf32>
    %c0_4 = arith.constant 0 : index
    %c0_5 = arith.constant 0 : index
    %6 = vector.load %arg4[%c0_4, %c0_5] : memref<1x128xf32, #tpu.memory_space<vmem>>, vector<1x128xf32>
    %7 = vector.broadcast %6 : vector<1x128xf32> to vector<8x128xf32>
    %8 = arith.addf %5, %7 : vector<8x128xf32>
    %9 = math.sin %8 : vector<8x128xf32>
    %c0_6 = arith.constant 0 : index
    %c0_7 = arith.constant 0 : index
    %c0_8 = arith.constant 0 : index
    %10 = vector.load %arg5[%c0_6, %c0_7, %c0_8] : memref<1x128x256xf32, #tpu.memory_space<vmem>>, vector<1x128x256xf32>
    %11 = vector.shape_cast %10 : vector<1x128x256xf32> to vector<128x256xf32>
    %cst = arith.constant dense<0.000000e+00> : vector<8x256xf32>
    %12 = tpu.matmul %9, %11, %cst {dimension_numbers = #tpu.dot_dimension_numbers<[1], [0], [0], [1], [0, 0, 1, 1], [], []>} : vector<8x128xf32>, vector<128x256xf32>, vector<8x256xf32> -> vector<8x256xf32>
    %c0_9 = arith.constant 0 : index
    %c0_10 = arith.constant 0 : index
    %c0_11 = arith.constant 0 : index
    %13 = vector.load %arg6[%c0_9, %c0_10, %c0_11] : memref<1x1x256xf32, #tpu.memory_space<vmem>>, vector<1x1x256xf32>
    %14 = vector.shape_cast %13 : vector<1x1x256xf32> to vector<1x256xf32>
    %15 = vector.broadcast %14 : vector<1x256xf32> to vector<8x256xf32>
    %16 = arith.addf %12, %15 : vector<8x256xf32>
    %cst_12 = arith.constant 2.000000e-01 : f32
    %17 = vector.broadcast %cst_12 : f32 to vector<8x256xf32>
    %18 = arith.mulf %17, %16 : vector<8x256xf32>
    %19 = arith.maximumf %16, %18 : vector<8x256xf32>
    %c0_13 = arith.constant 0 : index
    %c0_14 = arith.constant 0 : index
    %c0_15 = arith.constant 0 : index
    %20 = vector.load %arg7[%c0_13, %c0_14, %c0_15] : memref<1x256x256xf32, #tpu.memory_space<vmem>>, vector<1x256x256xf32>
    %21 = vector.shape_cast %20 : vector<1x256x256xf32> to vector<256x256xf32>
    %cst_16 = arith.constant dense<0.000000e+00> : vector<8x256xf32>
    %22 = tpu.matmul %19, %21, %cst_16 {dimension_numbers = #tpu.dot_dimension_numbers<[1], [0], [0], [1], [0, 0, 1, 1], [], []>} : vector<8x256xf32>, vector<256x256xf32>, vector<8x256xf32> -> vector<8x256xf32>
    %c0_17 = arith.constant 0 : index
    %c0_18 = arith.constant 0 : index
    %c0_19 = arith.constant 0 : index
    %23 = vector.load %arg8[%c0_17, %c0_18, %c0_19] : memref<1x1x256xf32, #tpu.memory_space<vmem>>, vector<1x1x256xf32>
    %24 = vector.shape_cast %23 : vector<1x1x256xf32> to vector<1x256xf32>
    %25 = vector.broadcast %24 : vector<1x256xf32> to vector<8x256xf32>
    %26 = arith.addf %22, %25 : vector<8x256xf32>
    %cst_20 = arith.constant 2.000000e-01 : f32
    %27 = vector.broadcast %cst_20 : f32 to vector<8x256xf32>
    %28 = arith.mulf %27, %26 : vector<8x256xf32>
    %29 = arith.maximumf %26, %28 : vector<8x256xf32>
    %c0_21 = arith.constant 0 : index
    %c0_22 = arith.constant 0 : index
    %c0_23 = arith.constant 0 : index
    %30 = vector.load %arg9[%c0_21, %c0_22, %c0_23] : memref<1x256x256xf32, #tpu.memory_space<vmem>>, vector<1x256x256xf32>
    %31 = vector.shape_cast %30 : vector<1x256x256xf32> to vector<256x256xf32>
    %cst_24 = arith.constant dense<0.000000e+00> : vector<8x256xf32>
    %32 = tpu.matmul %29, %31, %cst_24 {dimension_numbers = #tpu.dot_dimension_numbers<[1], [0], [0], [1], [0, 0, 1, 1], [], []>} : vector<8x256xf32>, vector<256x256xf32>, vector<8x256xf32> -> vector<8x256xf32>
    %c0_25 = arith.constant 0 : index
    %c0_26 = arith.constant 0 : index
    %c0_27 = arith.constant 0 : index
    %33 = vector.load %arg10[%c0_25, %c0_26, %c0_27] : memref<1x1x256xf32, #tpu.memory_space<vmem>>, vector<1x1x256xf32>
    %34 = vector.shape_cast %33 : vector<1x1x256xf32> to vector<1x256xf32>
    %35 = vector.broadcast %34 : vector<1x256xf32> to vector<8x256xf32>
    %36 = arith.addf %32, %35 : vector<8x256xf32>
    %cst_28 = arith.constant 2.000000e-01 : f32
    %37 = vector.broadcast %cst_28 : f32 to vector<8x256xf32>
    %38 = arith.mulf %37, %36 : vector<8x256xf32>
    %39 = arith.maximumf %36, %38 : vector<8x256xf32>
    %c0_29 = arith.constant 0 : index
    %c0_30 = arith.constant 0 : index
    %c0_31 = arith.constant 0 : index
    %40 = vector.load %arg11[%c0_29, %c0_30, %c0_31] : memref<1x256x256xf32, #tpu.memory_space<vmem>>, vector<1x256x256xf32>
    %41 = vector.shape_cast %40 : vector<1x256x256xf32> to vector<256x256xf32>
    %cst_32 = arith.constant dense<0.000000e+00> : vector<8x256xf32>
    %42 = tpu.matmul %39, %41, %cst_32 {dimension_numbers = #tpu.dot_dimension_numbers<[1], [0], [0], [1], [0, 0, 1, 1], [], []>} : vector<8x256xf32>, vector<256x256xf32>, vector<8x256xf32> -> vector<8x256xf32>
    %c0_33 = arith.constant 0 : index
    %c0_34 = arith.constant 0 : index
    %c0_35 = arith.constant 0 : index
    %43 = vector.load %arg12[%c0_33, %c0_34, %c0_35] : memref<1x1x256xf32, #tpu.memory_space<vmem>>, vector<1x1x256xf32>
    %44 = vector.shape_cast %43 : vector<1x1x256xf32> to vector<1x256xf32>
    %45 = vector.broadcast %44 : vector<1x256xf32> to vector<8x256xf32>
    %46 = arith.addf %42, %45 : vector<8x256xf32>
    %cst_36 = arith.constant 2.000000e-01 : f32
    %47 = vector.broadcast %cst_36 : f32 to vector<8x256xf32>
    %48 = arith.mulf %47, %46 : vector<8x256xf32>
    %49 = arith.maximumf %46, %48 : vector<8x256xf32>
    %c0_37 = arith.constant 0 : index
    %c0_38 = arith.constant 0 : index
    %c0_39 = arith.constant 0 : index
    %50 = vector.load %arg13[%c0_37, %c0_38, %c0_39] : memref<1x256x128xf32, #tpu.memory_space<vmem>>, vector<1x256x128xf32>
    %51 = vector.shape_cast %50 : vector<1x256x128xf32> to vector<256x128xf32>
    %cst_40 = arith.constant dense<0.000000e+00> : vector<8x128xf32>
    %52 = tpu.matmul %49, %51, %cst_40 {dimension_numbers = #tpu.dot_dimension_numbers<[1], [0], [0], [1], [0, 0, 1, 1], [], []>} : vector<8x256xf32>, vector<256x128xf32>, vector<8x128xf32> -> vector<8x128xf32>
    %c0_41 = arith.constant 0 : index
    %c0_42 = arith.constant 0 : index
    %c0_43 = arith.constant 0 : index
    %53 = vector.load %arg14[%c0_41, %c0_42, %c0_43] : memref<1x1x128xf32, #tpu.memory_space<vmem>>, vector<1x1x128xf32>
    %54 = vector.shape_cast %53 : vector<1x1x128xf32> to vector<1x128xf32>
    %55 = vector.broadcast %54 : vector<1x128xf32> to vector<8x128xf32>
    %56 = arith.addf %52, %55 : vector<8x128xf32>
    %c0_44 = arith.constant 0 : index
    %c0_45 = arith.constant 0 : index
    %c0_46 = arith.constant 0 : index
    %57 = vector.load %arg15[%c0_44, %c0_45, %c0_46] : memref<1x8x128xf32, #tpu.memory_space<vmem>>, vector<1x8x128xf32>
    %58 = vector.shape_cast %57 : vector<1x8x128xf32> to vector<8x128xf32>
    %59 = vector.shape_cast %56 : vector<8x128xf32> to vector<1x8x128xf32>
    tpu.vector_store %arg15[%c0_44, %c0_45, %c0_46], %59 {strides = array<i32>} : memref<1x8x128xf32, #tpu.memory_space<vmem>>, vector<1x8x128xf32>,
    return
  }
  func.func @transform_0(%arg0: i32, %arg1: i32) -> (i32, i32, i32) {
    %c0_i32 = arith.constant 0 : i32
    %c0_i32_0 = arith.constant 0 : i32
    return %arg0, %arg1, %c0_i32 : i32, i32, i32
  }
  func.func @transform_1(%arg0: i32, %arg1: i32) -> (i32, i32) {
    %c0_i32 = arith.constant 0 : i32
    %c0_i32_0 = arith.constant 0 : i32
    %c0_i32_1 = arith.constant 0 : i32
    return %c0_i32, %c0_i32_0 : i32, i32
  }
  func.func @transform_2(%arg0: i32, %arg1: i32) -> (i32, i32) {
    %c0_i32 = arith.constant 0 : i32
    %c0_i32_0 = arith.constant 0 : i32
    %c0_i32_1 = arith.constant 0 : i32
    return %c0_i32, %c0_i32_0 : i32, i32
  }
  func.func @transform_3(%arg0: i32, %arg1: i32) -> (i32, i32, i32) {
    %c0_i32 = arith.constant 0 : i32
    %c0_i32_0 = arith.constant 0 : i32
    %c0_i32_1 = arith.constant 0 : i32
    return %arg0, %c0_i32, %c0_i32_0 : i32, i32, i32
  }
  func.func @transform_4(%arg0: i32, %arg1: i32) -> (i32, i32, i32) {
    %c0_i32 = arith.constant 0 : i32
    %c0_i32_0 = arith.constant 0 : i32
    %c0_i32_1 = arith.constant 0 : i32
    return %arg0, %c0_i32, %c0_i32_0 : i32, i32, i32
  }
  func.func @transform_5(%arg0: i32, %arg1: i32) -> (i32, i32, i32) {
    %c0_i32 = arith.constant 0 : i32
    %c0_i32_0 = arith.constant 0 : i32
    %c0_i32_1 = arith.constant 0 : i32
    return %arg0, %c0_i32, %c0_i32_0 : i32, i32, i32
  }
  func.func @transform_6(%arg0: i32, %arg1: i32) -> (i32, i32, i32) {
    %c0_i32 = arith.constant 0 : i32
    %c0_i32_0 = arith.constant 0 : i32
    %c0_i32_1 = arith.constant 0 : i32
    return %arg0, %c0_i32, %c0_i32_0 : i32, i32, i32
  }
  func.func @transform_7(%arg0: i32, %arg1: i32) -> (i32, i32, i32) {
    %c0_i32 = arith.constant 0 : i32
    %c0_i32_0 = arith.constant 0 : i32
    %c0_i32_1 = arith.constant 0 : i32
    return %arg0, %c0_i32, %c0_i32_0 : i32, i32, i32
  }
  func.func @transform_8(%arg0: i32, %arg1: i32) -> (i32, i32, i32) {
    %c0_i32 = arith.constant 0 : i32
    %c0_i32_0 = arith.constant 0 : i32
    %c0_i32_1 = arith.constant 0 : i32
    return %arg0, %c0_i32, %c0_i32_0 : i32, i32, i32
  }
  func.func @transform_9(%arg0: i32, %arg1: i32) -> (i32, i32, i32) {
    %c0_i32 = arith.constant 0 : i32
    %c0_i32_0 = arith.constant 0 : i32
    %c0_i32_1 = arith.constant 0 : i32
    return %arg0, %c0_i32, %c0_i32_0 : i32, i32, i32
  }
  func.func @transform_10(%arg0: i32, %arg1: i32) -> (i32, i32, i32) {
    %c0_i32 = arith.constant 0 : i32
    %c0_i32_0 = arith.constant 0 : i32
    %c0_i32_1 = arith.constant 0 : i32
    return %arg0, %c0_i32, %c0_i32_0 : i32, i32, i32
  }
  func.func @transform_11(%arg0: i32, %arg1: i32) -> (i32, i32, i32) {
    %c0_i32 = arith.constant 0 : i32
    %c0_i32_0 = arith.constant 0 : i32
    %c0_i32_1 = arith.constant 0 : i32
    return %arg0, %c0_i32, %c0_i32_0 : i32, i32, i32
  }
  func.func @transform_12(%arg0: i32, %arg1: i32) -> (i32, i32, i32) {
    %c0_i32 = arith.constant 0 : i32
    %c0_i32_0 = arith.constant 0 : i32
    %c0_i32_1 = arith.constant 0 : i32
    return %arg0, %c0_i32, %c0_i32_0 : i32, i32, i32
  }
  func.func @transform_13(%arg0: i32, %arg1: i32) -> (i32, i32, i32) {
    %c0_i32 = arith.constant 0 : i32
    %c0_i32_0 = arith.constant 0 : i32
    return %arg0, %arg1, %c0_i32 : i32, i32, i32
  }
}

</mosaic_0001>

<bundles_post_ra>
// kernel: tpu_custom_call.1
= control target key start
LH: loop header
LB: loop body
LE: loop exit
PB: predicated region body
PF: predicated region fallthrough
CT: control target
= control target key end

     0   :  { %s3254_s0 = inlined_call_operand.vmem [shape: f32[3,8,1], index: 0, kind: input, shape index: {}]   ;;  %s3255_s1 = inlined_call_operand.vmem [shape: f32[1,128], index: 1, kind: input, shape index: {}]   ;;  %s3256_s2 = inlined_call_operand.vmem [shape: f32[1,128], index: 2, kind: input, shape index: {}]   ;;  %s3257_s3 = inlined_call_operand.hbm [shape: f32[3,128,256], index: 3, kind: input, shape index: {}]   ;;  %s3258_s4 = inlined_call_operand.vmem [shape: f32[3,1,256], index: 4, kind: input, shape index: {}]   ;;  %s3259_s5 = inlined_call_operand.hbm [shape: f32[3,256,256], index: 5, kind: input, shape index: {}]   ;;  %s3260_s6 = inlined_call_operand.vmem [shape: f32[3,1,256], index: 6, kind: input, shape index: {}]   ;;  %s3261_s7 = inlined_call_operand.hbm [shape: f32[3,256,256], index: 7, kind: input, shape index: {}]   ;;  %s3262_s8 = inlined_call_operand.vmem [shape: f32[3,1,256], index: 8, kind: input, shape index: {}]   ;;  %s3263_s9 = inlined_call_operand.hbm [shape: f32[3,256,256], index: 9, kind: input, shape index: {}]   ;;  %s3264_s10 = inlined_call_operand.vmem [shape: f32[3,1,256], index: 10, kind: input, shape index: {}]   ;;  %s3265_s11 = inlined_call_operand.hbm [shape: f32[3,256,128], index: 11, kind: input, shape index: {}]   ;;  %s3266_s12 = inlined_call_operand.vmem [shape: f32[3,1,128], index: 12, kind: input, shape index: {}]   ;;  %s3267_s13 = inlined_call_operand.hbm [shape: f32[3,8,128], index: 13, kind: output, shape index: {}]  }
   0x1   :  { %3285 = sst [smem:[#allocation23_spill]] %s3255_s1 }
   0x2   :  { %3286 = sst [smem:[#allocation24_spill]] %s3256_s2 }
   0x3   :  { %3287 = sst [smem:[#allocation25_spill]] %s3257_s3 }
   0x4   :  { %3288 = sst [smem:[#allocation26_spill]] %s3258_s4 }
   0x5   :  { %3289 = sst [smem:[#allocation27_spill]] %s3259_s5 }
   0x6   :  { %3290 = sst [smem:[#allocation28_spill]] %s3260_s6 }
   0x7   :  { %3291 = sst [smem:[#allocation29_spill]] %s3262_s8 }
   0x8   :  { %3292 = sst [smem:[#allocation30_spill]] %s3263_s9 }
   0x9   :  { %3293 = sst [smem:[#allocation31_spill]] %s3264_s10 }
   0xa   :  { %3294 = sst [smem:[#allocation32_spill]] %s3266_s12 }
   0xb   :  { %3295 = sst [smem:[#allocation33_spill]] %s3267_s13 }
   0xc   :  { %18 = vsyncpa [#allocation3], 0 }
   0xd   :  { %20 = vsyncpa [#allocation3 + $0x1], 0 }
   0xe   :  { %21 = vsyncpa [#allocation6], 0 }
   0xf   :  { %23 = vsyncpa [#allocation6 + $0x1], 0 }
  0x10   :  { %24 = vsyncpa [#allocation9], 0 }
  0x11   :  { %26 = vsyncpa [#allocation9 + $0x1], 0 }
  0x12   :  { %27 = vsyncpa [#allocation4], 0 }
  0x13   :  { %29 = vsyncpa [#allocation4 + $0x1], 0  ;;  %s2568_s25 = smov 0   ;;  %s2570_s26 = smov 0  }
  0x14   :  { %s2572_s27 = smov 0   ;;  %s2574_s28 = smov 0  }
  0x15   :  { %s2576_s29 = smov 0   ;;  %s2578_s30 = smov 0  }
  0x16 LB: > { %3296 = sst [smem:[#allocation16_spill]] %s2458_s25  ;;  %s2599_s14 = sadd.s32 4294967295, %s2478_s30   ;;  %s2478_s30 = sphi %s2578_s30, %s35_s30   ;;  %s2474_s29 = sphi %s2576_s29, %s3338_s29   ;;  %s2470_s28 = sphi %s2574_s28, %s3337_s28   ;;  %s2466_s27 = sphi %s2572_s27, %s3333_s27   ;;  %s2462_s26 = sphi %s2570_s26, %s3336_s26   ;;  %s2458_s25 = sphi %s2568_s25, %s3335_s25  }
  0x17   : > { %3297 = sst [smem:[#allocation17_spill]] %s2466_s27  ;;  %s1798_s15 = sadd.s32 4294967294, %s2478_s30  }
  0x18   : > { %3298 = sst [smem:[#allocation18_spill]] %s2478_s30  ;;  %s47_s16 = sadd.s32 1, %s2474_s29 }
  0x19   : > { %s124_s17 = sadd.s32 1, %s2466_s27  ;;  %p49_p0 = scmp.ge.s32.totalorder %s47_s16, 3 }
  0x1a   : > { %p131_p1 = scmp.ne.s32.totalorder %s2466_s27, %s2462_s26  ;;  %p132_p2 = scmp.eq.s32.totalorder %s2478_s30, 0 }
  0x1b   : > { %p137_p3 = scmp.ne.s32.totalorder %s2462_s26, %s2458_s25  ;;  %s3340_s16 = smov (%p49_p0, %s47_s16), 0 }
  0x1c   : > { %3299 = sst [smem:[#allocation19_spill]] %s3340_s16  ;;  %p133_p4 = por %p132_p2, %p131_p1 }
  0x1d   : > { %p138_p5 = scmp.eq.s32.totalorder %s2599_s14, 0  ;;  %s121_s18 = ssub.s32 %s2474_s29, %s3340_s16 }
  0x1e   : > { %p397_p6 = scmp.eq.s32.totalorder %s2599_s14, 2  ;;  %p122_p7 = scmp.eq.s32.totalorder %s121_s18, 0 }
  0x1f   : > { %p2615_p8 = por %p138_p5, %p137_p3  ;;  %p403_p10 = scmp.eq.s32.totalorder %s1798_s15, 2 }
  0x20   : > { %p2619_p9 = por %p397_p6, %p131_p1  ;;  %p2171_p12 = scmp.lt.s32.totalorder %s2478_s30, 3 }
  0x21   : > { %s3300_s19 = scalar_select %p2615_p8, 1, 0 }
  0x22   : > { %s3301_s20 = scalar_select %p2619_p9, 1, 0 }
  0x23   : > { %s2624_s21 = scalar_select %p122_p7, %s2466_s27, %s124_s17  }
  0x24   : > { %3302 = sst [smem:[#allocation20_spill]] %s3301_s20  ;;  %p2626_p11 = por %p403_p10, %p137_p3 }
  0x25   : > { %3303 = sst [smem:[#allocation21_spill]] %s2624_s21  ;;  %s2632_s23 = sand.u32 1, %s2466_s27  }
  0x26   : > { %s3304_s22 = scalar_select %p2626_p11, 1, 0 }
  0x27   : > { %p2634_p13 = pnand %p2171_p12, %p133_p4  ;;  %s3275_s18 = sand.u32 1, %s2478_s30  }
  0x28   : > { %3305 = sst [smem:[#allocation22_spill]] %s3304_s22  ;;  %s2640_s16 = sshll.u32 %s2632_s23, 9 }
  0x29   : > { %s2643_s15 = sshll.u32 %s2474_s29, 13  ;;  %s471_s17 = scalar_lea.vmem [#allocation5], %s2640_s16 }
  0x2a   : > { %s478_s21 = sshll.u32 %s471_s17, 4  ;;  %s3307_s5 = sld [smem:[#allocation27_spill]]  ;;  %s2652_s21 = int_to_ptr.vmem [resolvable:$true] %s478_s21 }
  0x2b   : > { %s2656_s13 = scalar_lea.sflag [#allocation6], %s3275_s18  ;;  %p2662_p1 = pneg %p2634_p13 }
  0x30   : > { %s2650_s27 = scalar_lea.hbm %s3307_s5, %s2643_s15  ;;  %s2243_s17 = scalar_lea.hbm %s3307_s5, 24576 }
  0x31   : > { %s2238_s20 = scalar_lea.hbm %s2650_s27, 8192  ;;  %p2244_p4 = scmp.lt.u32.totalorder %s2650_s27, %s3307_s5 }
  0x32   : > { %p2239_p0 = scmp.ne.s32.totalorder %s2650_s27, %s2238_s20  ;;  %p2245_p5 = scmp.lt.u32.totalorder %s2243_s17, %s2238_s20 }
  0x33   : > { %p2247_p7 = scmp.lt.u32.totalorder %s2238_s20, %s2650_s27 }
  0x34   : > { %p2241_p2 = pnand %p2662_p1, %p2239_p0  ;;  %p2246_p6 = por %p2245_p5, %p2244_p4 }
  0x36   : > { %p2242_p3 = pneg %p2241_p2  ;;  %p2248_p10 = por %p2247_p7, %p2246_p6 }
  0x38   : > { %p2249_p12 = pnand %p2248_p10, %p2242_p3 }
  0x3a   : > { %2252 = shalt.err (!%p2249_p12)
}
  0x3b   : > { %s2253_s18 = scalar_lea.vmem %s2652_s21, 8192  ;;  %s2480_s25 = smov [#allocation5]  }
  0x3c   : > { %p2254_p0 = scmp.ne.s32.totalorder %s2652_s21, %s2253_s18  ;;  %s2258_s22 = sshll.u32 %s2480_s25, 4  ;;  %s2259_s22 = int_to_ptr.vmem [resolvable:$false] %s2258_s22 }
  0x3d   : > { %s2260_s8 = scalar_lea.vmem %s2259_s22, 16384  ;;  %p2261_p9 = scmp.lt.s32.totalorder %s2652_s21, %s2259_s22 }
  0x3e   : > { %p2256_p2 = pnand %p2254_p0, %p2662_p1  ;;  %p2262_p8 = scmp.lt.s32.totalorder %s2260_s8, %s2253_s18 }
  0x40   : > { %p2257_p11 = pneg %p2256_p2  ;;  %p2263_p4 = por %p2262_p8, %p2261_p9 }
  0x42   : > { %p2264_p5 = pnand %p2263_p4, %p2257_p11 }
  0x44   : > { %2267 = shalt.err (!%p2264_p5)
}
  0x45   : > { %s3278_s10 = smov 256   ;;  %s3280_s20 = smov 16  }
  0x46   : > { %2157 = dma.hbm_to_vmem [thread:$0]  (!%p2634_p13), %s2650_s27, 8192, %s2652_s21, %s2656_s13, %s3278_s10, %s3278_s10, %s3280_s20  }
  0x47   : > { %p1816_p8 = scmp.ge.s32.totalorder %s2478_s30, 1  ;;  %p576_p9 = scmp.lt.s32.totalorder %s2478_s30, 4 }
  0x48   : > { %s3310_s9 = sld [smem:[#allocation30_spill]]  ;;  %s527_s8 = scalar_lea.vmem [#allocation8], %s2640_s16 }
  0x49   : > { %p2691_p11 = pnand %p1816_p8, %p576_p9  ;;  %s534_s5 = sshll.u32 %s527_s8, 4  ;;  %s2702_s5 = int_to_ptr.vmem [resolvable:$true] %s534_s5 }
  0x4a   : > { %s3311_s27 = sand.u32 1, %s2478_s30  }
  0x4b   : > { %s3309_s18 = scalar_select %p2691_p11, 1, 0 }
  0x4c   : > { %s2706_s21 = scalar_lea.sflag [#allocation9], %s3311_s27 }
  0x4e   : > { %s2699_s22 = scalar_lea.hbm %s3310_s9, %s2643_s15  ;;  %s2273_s25 = scalar_lea.hbm %s3310_s9, 24576 }
  0x4f   : > { %s2268_s10 = scalar_lea.hbm %s2699_s22, 8192  ;;  %p2274_p10 = scmp.lt.u32.totalorder %s2699_s22, %s3310_s9 }
  0x50   : > { %p2269_p3 = scmp.ne.s32.totalorder %s2699_s22, %s2268_s10  ;;  %p2275_p12 = scmp.lt.u32.totalorder %s2273_s25, %s2268_s10 }
  0x51   : > { %p2277_p2 = scmp.lt.u32.totalorder %s2268_s10, %s2699_s22 }
  0x52   : > { %p2271_p6 = pnand %p2269_p3, %p2662_p1  ;;  %p2276_p0 = por %p2275_p12, %p2274_p10 }
  0x54   : > { %p2272_p7 = pneg %p2271_p6  ;;  %p2278_p4 = por %p2277_p2, %p2276_p0 }
  0x56   : > { %p2279_p5 = pnand %p2278_p4, %p2272_p7 }
  0x58   : > { %2282 = shalt.err (!%p2279_p5)
}
  0x59   : > { %s2283_s8 = scalar_lea.vmem %s2702_s5, 8192  ;;  %s2483_s20 = smov [#allocation8]  }
  0x5a   : > { %p2284_p8 = scmp.ne.s32.totalorder %s2702_s5, %s2283_s8  ;;  %s2288_s27 = sshll.u32 %s2483_s20, 4  ;;  %s2289_s27 = int_to_ptr.vmem [resolvable:$false] %s2288_s27 }
  0x5b   : > { %s2290_s4 = scalar_lea.vmem %s2289_s27, 16384  ;;  %p2291_p6 = scmp.lt.s32.totalorder %s2702_s5, %s2289_s27 }
  0x5c   : > { %p2286_p9 = pnand %p2284_p8, %p2662_p1  ;;  %p2292_p11 = scmp.lt.s32.totalorder %s2290_s4, %s2283_s8 }
  0x5e   : > { %p2287_p3 = pneg %p2286_p9  ;;  %p2293_p10 = por %p2292_p11, %p2291_p6 }
  0x60   : > { %p2294_p12 = pnand %p2293_p10, %p2287_p3 }
  0x62   : > { %2297 = shalt.err (!%p2294_p12)
}
  0x63   : > { %s3312_s6 = smov 16   ;;  %s3313_s10 = smov 256  }
  0x64   : > { %2163 = dma.hbm_to_vmem [thread:$0]  (!%p2634_p13), %s2699_s22, 8192, %s2702_s5, %s2706_s21, %s3313_s10, %s3313_s10, %s3312_s6  }
  0x65   : > { %s1801_s17 = sshll.u32 %s2632_s23, 8  ;;  %s3284_s25 = sshll.u32 %s2474_s29, 12 }
  0x66   : > { %s3314_s3 = sld [smem:[#allocation25_spill]]  ;;  %s443_s4 = scalar_lea.vmem [#allocation2], %s1801_s17 }
  0x67   : > { %s450_s9 = sshll.u32 %s443_s4, 4  ;;  %s440_s30 = scalar_lea.sflag [#allocation3], %s2632_s23  ;;  %s2744_s9 = int_to_ptr.vmem [resolvable:$true] %s450_s9 }
  0x6c   : > { %s2740_s27 = scalar_lea.hbm %s3314_s3, %s3284_s25  ;;  %s2303_s8 = scalar_lea.hbm %s3314_s3, 12288 }
  0x6d   : > { %s2298_s2 = scalar_lea.hbm %s2740_s27, 4096  ;;  %p2304_p2 = scmp.lt.u32.totalorder %s2740_s27, %s3314_s3 }
  0x6e   : > { %p2299_p11 = scmp.ne.s32.totalorder %s2740_s27, %s2298_s2  ;;  %p2305_p4 = scmp.lt.u32.totalorder %s2303_s8, %s2298_s2 }
  0x6f   : > { %p2307_p8 = scmp.lt.u32.totalorder %s2298_s2, %s2740_s27 }
  0x70   : > { %p2301_p7 = pnand %p2299_p11, %p2662_p1  ;;  %p2306_p5 = por %p2305_p4, %p2304_p2 }
  0x72   : > { %p2302_p0 = pneg %p2301_p7  ;;  %p2308_p9 = por %p2307_p8, %p2306_p5 }
  0x74   : > { %p2309_p3 = pnand %p2308_p9, %p2302_p0 }
  0x76   : > { %2312 = shalt.err (!%p2309_p3)
}
  0x77   : > { %s2313_s4 = scalar_lea.vmem %s2744_s9, 4096  ;;  %s2484_s5 = smov [#allocation2]  }
  0x78   : > { %p2314_p6 = scmp.ne.s32.totalorder %s2744_s9, %s2313_s4  ;;  %s2318_s22 = sshll.u32 %s2484_s5, 4  ;;  %s2319_s22 = int_to_ptr.vmem [resolvable:$false] %s2318_s22 }
  0x79   : > { %s2320_s25 = scalar_lea.vmem %s2319_s22, 8192  ;;  %p2321_p11 = scmp.lt.s32.totalorder %s2744_s9, %s2319_s22 }
  0x7a   : > { %p2316_p10 = pnand %p2314_p6, %p2662_p1  ;;  %p2322_p7 = scmp.lt.s32.totalorder %s2320_s25, %s2313_s4 }
  0x7c   : > { %p2317_p12 = pneg %p2316_p10  ;;  %p2323_p2 = por %p2322_p7, %p2321_p11 }
  0x7e   : > { %p2324_p4 = pnand %p2323_p2, %p2317_p12 }
  0x80   : > { %2327 = shalt.err (!%p2324_p4)
}
  0x81   : > { %2154 = dma.hbm_to_vmem [thread:$0]  (!%p2634_p13), %s2740_s27, 4096, %s2744_s9, %s440_s30, %s3313_s10, %s3313_s10, %s3312_s6  }
  0x82   : > { %s3315_s2 = sshll.u32 %s2474_s29, 12  ;;  %s555_s5 = scalar_lea.vmem [#allocation10], %s1801_s17 }
  0x83   : > { %s2778_s4 = scalar_lea.hbm %s3265_s11, %s3315_s2  ;;  %s562_s22 = sshll.u32 %s555_s5, 4  ;;  %s2782_s22 = int_to_ptr.vmem [resolvable:$true] %s562_s22 }
  0x84   : > { %s2788_s1 = scalar_lea.hbm %s3261_s7, %s2643_s15  ;;  %s499_s9 = scalar_lea.vmem [#allocation7], %s2640_s16 }
  0x85   : > { %s506_s30 = sshll.u32 %s499_s9, 4  ;;  %s2328_s27 = scalar_lea.hbm %s2788_s1, 8192  ;;  %s2791_s30 = int_to_ptr.vmem [resolvable:$true] %s506_s30 }
  0x86   : > { %p2329_p0 = scmp.ne.s32.totalorder %s2788_s1, %s2328_s27  ;;  %s2333_s2 = scalar_lea.hbm %s3261_s7, 24576 }
  0x87   : > { %p2334_p9 = scmp.lt.u32.totalorder %s2788_s1, %s3261_s7  ;;  %p2335_p3 = scmp.lt.u32.totalorder %s2333_s2, %s2328_s27 }
  0x88   : > { %p2331_p5 = pnand %p2329_p0, %p2662_p1  ;;  %p2337_p10 = scmp.lt.u32.totalorder %s2328_s27, %s2788_s1 }
  0x89   : > { %p2336_p6 = por %p2335_p3, %p2334_p9 }
  0x8a   : > { %p2332_p8 = pneg %p2331_p5 }
  0x8b   : > { %p2338_p12 = por %p2337_p10, %p2336_p6 }
  0x8d   : > { %p2339_p11 = pnand %p2338_p12, %p2332_p8 }
  0x8f   : > { %2342 = shalt.err (!%p2339_p11)
}
  0x90   : > { %s2343_s16 = scalar_lea.vmem %s2791_s30, 8192  ;;  %s2485_s8 = smov [#allocation7]  }
  0x91   : > { %p2344_p7 = scmp.ne.s32.totalorder %s2791_s30, %s2343_s16  ;;  %s2348_s20 = sshll.u32 %s2485_s8, 4  ;;  %s2349_s20 = int_to_ptr.vmem [resolvable:$false] %s2348_s20 }
  0x92   : > { %s2350_s5 = scalar_lea.vmem %s2349_s20, 16384  ;;  %p2351_p0 = scmp.lt.s32.totalorder %s2791_s30, %s2349_s20 }
  0x93   : > { %p2346_p2 = pnand %p2344_p7, %p2662_p1  ;;  %p2352_p5 = scmp.lt.s32.totalorder %s2350_s5, %s2343_s16 }
  0x95   : > { %p2347_p4 = pneg %p2346_p2  ;;  %p2353_p9 = por %p2352_p5, %p2351_p0 }
  0x97   : > { %p2354_p3 = pnand %p2353_p9, %p2347_p4 }
  0x99   : > { %2357 = shalt.err (!%p2354_p3)
}
  0x9a   : > { %2160 = dma.hbm_to_vmem [thread:$0]  (!%p2634_p13), %s2788_s1, 8192, %s2791_s30, %s2656_s13, %s3313_s10, %s3313_s10, %s3312_s6  }
  0x9b   : > { %s2358_s25 = scalar_lea.hbm %s2778_s4, 4096  ;;  %s2363_s23 = scalar_lea.hbm %s3265_s11, 12288 }
  0x9c   : > { %p2359_p8 = scmp.ne.s32.totalorder %s2778_s4, %s2358_s25  ;;  %p2364_p12 = scmp.lt.u32.totalorder %s2778_s4, %s3265_s11 }
  0x9d   : > { %p2365_p11 = scmp.lt.u32.totalorder %s2363_s23, %s2358_s25  ;;  %p2367_p2 = scmp.lt.u32.totalorder %s2358_s25, %s2778_s4 }
  0x9e   : > { %p2361_p6 = pnand %p2359_p8, %p2662_p1 }
  0x9f   : > { %p2366_p7 = por %p2365_p11, %p2364_p12 }
  0xa0   : > { %p2362_p10 = pneg %p2361_p6 }
  0xa1   : > { %p2368_p4 = por %p2367_p2, %p2366_p7 }
  0xa3   : > { %p2369_p0 = pnand %p2368_p4, %p2362_p10 }
  0xa5   : > { %2372 = shalt.err (!%p2369_p0)
}
  0xa6   : > { %s2373_s1 = scalar_lea.vmem %s2782_s22, 4096  ;;  %s2486_s13 = smov [#allocation10]  }
  0xa7   : > { %p2374_p5 = scmp.ne.s32.totalorder %s2782_s22, %s2373_s1  ;;  %s2378_s6 = sshll.u32 %s2486_s13, 4  ;;  %s2379_s6 = int_to_ptr.vmem [resolvable:$false] %s2378_s6 }
  0xa8   : > { %s2380_s10 = scalar_lea.vmem %s2379_s6, 8192  ;;  %p2381_p8 = scmp.lt.s32.totalorder %s2782_s22, %s2379_s6 }
  0xa9   : > { %p2376_p9 = pnand %p2374_p5, %p2662_p1  ;;  %p2382_p6 = scmp.lt.s32.totalorder %s2380_s10, %s2373_s1 }
  0xab   : > { %p2377_p3 = pneg %p2376_p9  ;;  %p2383_p12 = por %p2382_p6, %p2381_p8 }
  0xad   : > { %p2384_p11 = pnand %p2383_p12, %p2377_p3 }
  0xaf   : > { %2387 = shalt.err (!%p2384_p11)
}
  0xb0   : > { %s2487_s30 = smov 128   ;;  %s2488_s3 = smov 8  }
  0xb1   : > { %2166 = dma.hbm_to_vmem [thread:$0]  (!%p2634_p13), %s2778_s4, 4096, %s2782_s22, %s2706_s21, %s2487_s30, %s2487_s30, %s2488_s3  }
  0xb2   : > { %p3316_p1 = scmp.ne.s32.totalorder %s3309_s18, 0 }
  0xb3   : > { %s2843_s12 = sand.u32 (!%p3316_p1), 1, %s2462_s26   ;;  %p3317_p10 = scmp.ne.s32.totalorder (!%p3316_p1), %s3300_s19, 0 }
  0xb4   : > { %580 = sbr.rel (%p3316_p1) target bundleno = 1523 (0x5f3), region = 72  ;;  %s1817_s15 = sshll.u32 (!%p3316_p1), %s2843_s12, 8 }
  0xb5   : > { %s583_s16 = scalar_lea.sflag (!%p3316_p1), [#allocation3], %s2843_s12  ;;  %s2849_s8 = scalar_lea.vmem (!%p3316_p1), [#allocation2], %s1817_s15 }
  0xbb   : > { %2441 = dma.done.wait (%p3317_p10), %s583_s16, 4096  }
  0xbc   : > { %2443 = vsyncadd (%p3317_p10), %s583_s16, 4294963200  ;;  %s591_s24 = sand.u32 1, %s2599_s14   ;;  %s1818_s18 = sshll.u32 %s2843_s12, 9 }
  0xbd   : > { %s592_s21 = scalar_lea.sflag [#allocation6], %s591_s24  ;;  %s2857_s4 = scalar_lea.vmem [#allocation5], %s1818_s18 }
  0xbe   : > { %2445 = dma.done.wait (%p3317_p10), %s592_s21, 16384  }
  0xbf   : > { %2447 = vsyncadd (%p3317_p10), %s592_s21, 4294950912  ;;  %s2863_s22 = scalar_lea.vmem [#allocation7], %s1818_s18  ;;  %s610_s20 = scalar_lea.sflag [#allocation9], %s591_s24 }
  0xc0   : > { %s2865_s5 = scalar_lea.vmem [#allocation8], %s1818_s18 }
  0xc1   : > { %2449 = dma.done.wait (%p3317_p10), %s610_s20, 12288  }
  0xc2   : > { %2451 = vsyncadd (%p3317_p10), %s610_s20, 4294955008  ;;  %p711_p13 = scmp.lt.s32.totalorder %s2470_s28, 2  ;;  %v2489_v0 = vmov 0   ;;  %v864_v2 = vld [vmem:[%s2849_s8 + $0x8] sm:$0xff]  ;;  %v866_v3 = vld [vmem:[%s2849_s8 + $0x18] sm:$0xff]  ;;  %v2490_v9 = vmov 0.0  }
  0xc3   : > { %2233 = vset.pattern.permute.xlu0 %v2489_v0  ;;  %v863_v4 = vld [vmem:[%s2849_s8] sm:$0xff]  ;;  %v1879_v5 = vpack.c.bf16 %v866_v3, %v864_v2  ;;  %v865_v6 = vld [vmem:[%s2849_s8 + $0x10] sm:$0xff]  ;;  %v868_v7 = vld [vmem:[%s2849_s8 + $0x28] sm:$0xff]  ;;  %971 = vmatprep.mubr.f32.mxu0 %v2490_v9  ;;  %s3318_s2 = sld [smem:[#allocation23_spill]]  ;;  %s3319_s6 = sld [smem:[#allocation24_spill]] }
  0xc4   : > { %s2873_s14 = scalar_select %p711_p13, %s2470_s28, 2  ;;  %v870_v8 = vld [vmem:[%s2849_s8 + $0x38] sm:$0xff]  ;;  %v1881_v10 = vpack.c.bf16 %v865_v6, %v863_v4  ;;  %v867_v12 = vld [vmem:[%s2849_s8 + $0x20] sm:$0xff]  ;;  %v869_v13 = vld [vmem:[%s2849_s8 + $0x30] sm:$0xff] }
  0xc5   : > { %v1883_v11 = vpack.c.bf16 %v870_v8, %v868_v7  ;;  %v872_v14 = vld [vmem:[%s2849_s8 + $0x48] sm:$0xff]  ;;  %1880 = vmatprep.subr.bf16.mxu0 %v1879_v5  ;;  %v874_v15 = vld [vmem:[%s2849_s8 + $0x58] sm:$0xff]  ;;  %v1885_v16 = vpack.c.bf16 %v869_v13, %v867_v12  ;;  %v871_v18 = vld [vmem:[%s2849_s8 + $0x40] sm:$0xff]  ;;  %s3320_s16 = sld [smem:[#allocation26_spill]]  ;;  %s3321_s21 = sld [smem:[#allocation28_spill]] }
  0xc6   : > { %s1823_s25 = sshll.u32 %s2873_s14, 3  ;;  %1882 = vmatpush1.bf16.msra.mxu0 %v1881_v10  ;;  %v1887_v17 = vpack.c.bf16 %v874_v15, %v872_v14  ;;  %v873_v19 = vld [vmem:[%s2849_s8 + $0x50] sm:$0xff]  ;;  %v876_v20 = vld [vmem:[%s2849_s8 + $0x68] sm:$0xff]  ;;  %v878_v21 = vld [vmem:[%s2849_s8 + $0x78] sm:$0xff]  ;;  %s3059_s10 = sshll.u32 %s2873_s14, 1 }
  0xc7   : > { %s717_s19 = scalar_lea.vmem %s3254_s0, %s1823_s25  ;;  %1884 = vmatprep.subr.bf16.mxu0 %v1883_v11  ;;  %v1889_v22 = vpack.c.bf16 %v873_v19, %v871_v18  ;;  %v1891_v23 = vpack.c.bf16 %v878_v21, %v876_v20  ;;  %v875_v24 = vld [vmem:[%s2849_s8 + $0x60] sm:$0xff]  ;;  %v877_v25 = vld [vmem:[%s2849_s8 + $0x70] sm:$0xff]  ;;  %v880_v26 = vld [vmem:[%s2849_s8 + $0x88] sm:$0xff]  ;;  %s1822_s17 = sshll.u32 %s2843_s12, 3 }
  0xc8   : > { %v737_v1 = vld [vmem:[%s717_s19] sm:$0xff]  ;;  %v882_v27 = vld [vmem:[%s2849_s8 + $0x98] sm:$0xff]  ;;  %v1893_v28 = vpack.c.bf16 %v877_v25, %v875_v24  ;;  %v881_v31 = vld [vmem:[%s2849_s8 + $0x90] sm:$0xff]  ;;  %s3323_s19 = sld [smem:[#allocation31_spill]]  ;;  %s3324_s13 = sld [smem:[#allocation32_spill]] }
  0xc9   : > { %741 = vperm.xlu0 %2233, %v737_v1   ;;  %v1895_v29 = vpack.c.bf16 %v882_v27, %v880_v26  ;;  %v879_v30 = vld [vmem:[%s2849_s8 + $0x80] sm:$0xff]  ;;  %v884_v32 = vld [vmem:[%s2849_s8 + $0xa8] sm:$0xff]  ;;  %v886_v33 = vld [vmem:[%s2849_s8 + $0xb8] sm:$0xff]  ;;  %s1836_s30 = sshll.u32 %s2470_s28, 7  ;;  %s710_s3 = scalar_lea.vmem [#allocation11], %s1822_s17 }
  0xca   : > { %1886 = vmatpush1.bf16.msra.mxu0 %v1885_v16  ;;  %v1897_v34 = vpack.c.bf16 %v881_v31, %v879_v30  ;;  %v1899_v35 = vpack.c.bf16 %v886_v33, %v884_v32  ;;  %v883_v36 = vld [vmem:[%s2849_s8 + $0xa0] sm:$0xff]  ;;  %v885_v37 = vld [vmem:[%s2849_s8 + $0xb0] sm:$0xff]  ;;  %v888_v38 = vld [vmem:[%s2849_s8 + $0xc8] sm:$0xff]  ;;  %s3326_s18 = sld [smem:[#allocation33_spill]]  ;;  %s2497_s28 = smov [#allocation11]  }
  0xcb   : > { %1888 = vmatprep.subr.bf16.mxu0 %v1887_v17  ;;  %v890_v39 = vld [vmem:[%s2849_s8 + $0xd8] sm:$0xff]  ;;  %v1901_v40 = vpack.c.bf16 %v885_v37, %v883_v36  ;;  %v887_v42 = vld [vmem:[%s2849_s8 + $0xc0] sm:$0xff]  ;;  %v889_v43 = vld [vmem:[%s2849_s8 + $0xd0] sm:$0xff] }
  0xcc   : > { %v1903_v41 = vpack.c.bf16 %v890_v39, %v888_v38  ;;  %v892_v44 = vld [vmem:[%s2849_s8 + $0xe8] sm:$0xff]  ;;  %v894_v45 = vld [vmem:[%s2849_s8 + $0xf8] sm:$0xff]  ;;  %v1905_v46 = vpack.c.bf16 %v889_v43, %v887_v42  ;;  %v891_v48 = vld [vmem:[%s2849_s8 + $0xe0] sm:$0xff] }
  0xcd   : > { %v1907_v47 = vpack.c.bf16 %v894_v45, %v892_v44  ;;  %v893_v49 = vld [vmem:[%s2849_s8 + $0xf0] sm:$0xff]  ;;  %v983_v51 = vld [vmem:[%s2857_s4 + $0x8] sm:$0xff]  ;;  %v985_v52 = vld [vmem:[%s2857_s4 + $0x18] sm:$0xff]  ;;  %s721_s8 = scalar_lea.vmem %s3320_s16, %s3059_s10  ;;  %s1560_s16 = sshll.u32 %s710_s3, 4  ;;  %s3208_s16 = int_to_ptr.vmem [resolvable:$true] %s1560_s16 }
  0xce   : > { %1890 = vmatpush1.bf16.msra.mxu0 %v1889_v22  ;;  %v1909_v50 = vpack.c.bf16 %v893_v49, %v891_v48  ;;  %v982_v53 = vld [vmem:[%s2857_s4] sm:$0xff]  ;;  %v1911_v54 = vpack.c.bf16 %v985_v52, %v983_v51  ;;  %v984_v55 = vld [vmem:[%s2857_s4 + $0x10] sm:$0xff]  ;;  %v987_v56 = vld [vmem:[%s2857_s4 + $0x28] sm:$0xff]  ;;  %s733_s23 = scalar_lea.vmem %s3323_s19, %s3059_s10 }
  0xcf   : > { %1892 = vmatprep.subr.bf16.mxu0 %v1891_v23  ;;  %v989_v57 = vld [vmem:[%s2857_s4 + $0x38] sm:$0xff]  ;;  %v1913_v58 = vpack.c.bf16 %v984_v55, %v982_v53  ;;  %v986_v60 = vld [vmem:[%s2857_s4 + $0x20] sm:$0xff]  ;;  %v988_v61 = vld [vmem:[%s2857_s4 + $0x30] sm:$0xff] }
  0xd0   : > { %v1915_v59 = vpack.c.bf16 %v989_v57, %v987_v56  ;;  %v991_v62 = vld [vmem:[%s2857_s4 + $0x48] sm:$0xff]  ;;  %1912 = vmatprep.subr.bf16.mxu1 %v1911_v54  ;;  %v993_v63 = vld [vmem:[%s2857_s4 + $0x58] sm:$0xff]  ;;  %v1917_v0 = vpack.c.bf16 %v988_v61, %v986_v60  ;;  %v990_v2 = vld [vmem:[%s2857_s4 + $0x40] sm:$0xff] }
  0xd1   : > { %1914 = vmatpush1.bf16.msra.mxu1 %v1913_v58  ;;  %v1919_v1 = vpack.c.bf16 %v993_v63, %v991_v62  ;;  %v992_v3 = vld [vmem:[%s2857_s4 + $0x50] sm:$0xff]  ;;  %v995_v4 = vld [vmem:[%s2857_s4 + $0x68] sm:$0xff]  ;;  %v997_v5 = vld [vmem:[%s2857_s4 + $0x78] sm:$0xff] }
  0xd2   : > { %1894 = vmatpush1.bf16.msra.mxu0 %v1893_v28  ;;  %1916 = vmatprep.subr.bf16.mxu1 %v1915_v59  ;;  %v1921_v6 = vpack.c.bf16 %v992_v3, %v990_v2  ;;  %v1923_v7 = vpack.c.bf16 %v997_v5, %v995_v4  ;;  %v994_v8 = vld [vmem:[%s2857_s4 + $0x60] sm:$0xff]  ;;  %v996_v9 = vld [vmem:[%s2857_s4 + $0x70] sm:$0xff]  ;;  %v999_v10 = vld [vmem:[%s2857_s4 + $0x88] sm:$0xff] }
  0xd3   : > { %1896 = vmatprep.subr.bf16.mxu0 %v1895_v29  ;;  %v1001_v11 = vld [vmem:[%s2857_s4 + $0x98] sm:$0xff]  ;;  %v1925_v12 = vpack.c.bf16 %v996_v9, %v994_v8  ;;  %v998_v14 = vld [vmem:[%s2857_s4 + $0x80] sm:$0xff]  ;;  %v1000_v15 = vld [vmem:[%s2857_s4 + $0x90] sm:$0xff] }
  0xd4   : > { %v1927_v13 = vpack.c.bf16 %v1001_v11, %v999_v10  ;;  %v1003_v16 = vld [vmem:[%s2857_s4 + $0xa8] sm:$0xff]  ;;  %v1005_v17 = vld [vmem:[%s2857_s4 + $0xb8] sm:$0xff]  ;;  %v1929_v18 = vpack.c.bf16 %v1000_v15, %v998_v14  ;;  %v1002_v20 = vld [vmem:[%s2857_s4 + $0xa0] sm:$0xff] }
  0xd5   : > { %1918 = vmatpush1.bf16.msra.mxu1 %v1917_v0  ;;  %v1931_v19 = vpack.c.bf16 %v1005_v17, %v1003_v16  ;;  %v1004_v21 = vld [vmem:[%s2857_s4 + $0xb0] sm:$0xff]  ;;  %v1007_v22 = vld [vmem:[%s2857_s4 + $0xc8] sm:$0xff]  ;;  %v1009_v23 = vld [vmem:[%s2857_s4 + $0xd8] sm:$0xff] }
  0xd6   : > { %1898 = vmatpush1.bf16.msra.mxu0 %v1897_v34  ;;  %1920 = vmatprep.subr.bf16.mxu1 %v1919_v1  ;;  %v1933_v24 = vpack.c.bf16 %v1004_v21, %v1002_v20  ;;  %v1935_v25 = vpack.c.bf16 %v1009_v23, %v1007_v22  ;;  %v1006_v26 = vld [vmem:[%s2857_s4 + $0xc0] sm:$0xff]  ;;  %v1008_v27 = vld [vmem:[%s2857_s4 + $0xd0] sm:$0xff]  ;;  %v1011_v28 = vld [vmem:[%s2857_s4 + $0xe8] sm:$0xff]  ;;  %v2491_v23 = vmov 2102212464  }
  0xd7   : > { %1900 = vmatprep.subr.bf16.mxu0 %v1899_v35  ;;  %v1013_v29 = vld [vmem:[%s2857_s4 + $0xf8] sm:$0xff]  ;;  %v1937_v30 = vpack.c.bf16 %v1008_v27, %v1006_v26  ;;  %v1010_v32 = vld [vmem:[%s2857_s4 + $0xe0] sm:$0xff]  ;;  %v1012_v33 = vld [vmem:[%s2857_s4 + $0xf0] sm:$0xff] }
  0xd8   : > { %v1939_v31 = vpack.c.bf16 %v1013_v29, %v1011_v28  ;;  %v1015_v34 = vld [vmem:[%s2857_s4 + $0x108] sm:$0xff]  ;;  %v1017_v35 = vld [vmem:[%s2857_s4 + $0x118] sm:$0xff]  ;;  %v1941_v36 = vpack.c.bf16 %v1012_v33, %v1010_v32  ;;  %v1014_v38 = vld [vmem:[%s2857_s4 + $0x100] sm:$0xff]  ;;  %v2493_v29 = vmov 1326507024  }
  0xd9   : > { %1922 = vmatpush1.bf16.msra.mxu1 %v1921_v6  ;;  %v1943_v37 = vpack.c.bf16 %v1017_v35, %v1015_v34  ;;  %v1016_v39 = vld [vmem:[%s2857_s4 + $0x110] sm:$0xff]  ;;  %v1018_v44 = vld [vmem:[%s2857_s4 + $0x120] sm:$0xff]  ;;  %v1027_v52 = vld [vmem:[%s2857_s4 + $0x168] sm:$0xff]  ;;  %v2495_v33 = vmov 2475754826  }
  0xda   : > { %1902 = vmatpush1.bf16.msra.mxu0 %v1901_v40  ;;  %1924 = vmatprep.subr.bf16.mxu1 %v1923_v7  ;;  %v1019_v40 = vld [vmem:[%s2857_s4 + $0x128] sm:$0xff]  ;;  %v1945_v42 = vpack.c.bf16 %v1016_v39, %v1014_v38  ;;  %v1020_v45 = vld [vmem:[%s2857_s4 + $0x130] sm:$0xff]  ;;  %v1029_v53 = vld [vmem:[%s2857_s4 + $0x178] sm:$0xff] }
  0xdb   : > { %1904 = vmatprep.subr.bf16.mxu0 %v1903_v41  ;;  %v1021_v41 = vld [vmem:[%s2857_s4 + $0x138] sm:$0xff]  ;;  %v1949_v48 = vpack.c.bf16 %v1020_v45, %v1018_v44  ;;  %v1024_v51 = vld [vmem:[%s2857_s4 + $0x150] sm:$0xff]  ;;  %v1828_v54 = vld [vmem:[%s3318_s2] ss:$0 sm:$0xff]  ;;  %v1955_v56 = vpack.c.bf16 %v1029_v53, %v1027_v52 }
  0xdc   : > { %v1947_v43 = vpack.c.bf16 %v1021_v41, %v1019_v40  ;;  %v1026_v57 = vld [vmem:[%s2857_s4 + $0x160] sm:$0xff]  ;;  %v1028_v58 = vld [vmem:[%s2857_s4 + $0x170] sm:$0xff]  ;;  %v1031_v61 = vld [vmem:[%s2857_s4 + $0x188] sm:$0xff] }
  0xdd   : > { %1926 = vmatpush1.bf16.msra.mxu1 %v1925_v12  ;;  %v1829_v59 = vld [vmem:[%s3319_s6] ss:$0 sm:$0xff]  ;;  %v1033_v62 = vld [vmem:[%s2857_s4 + $0x198] sm:$0xff]  ;;  %v1957_v0 = vpack.c.bf16 %v1028_v58, %v1026_v57  ;;  %v1032_v4 = vld [vmem:[%s2857_s4 + $0x190] sm:$0xff]  ;;  %s3325_s6 = sld [smem:[#allocation20_spill]] }
  0xde   : > { %1906 = vmatpush1.bf16.msra.mxu0 %v1905_v46  ;;  %1928 = vmatprep.subr.bf16.mxu1 %v1927_v13  ;;  %v1023_v46 = vld [vmem:[%s2857_s4 + $0x148] sm:$0xff]  ;;  %v1959_v2 = vpack.c.bf16 %v1033_v62, %v1031_v61  ;;  %v1030_v3 = vld [vmem:[%s2857_s4 + $0x180] sm:$0xff]  ;;  %v1037_v6 = vld [vmem:[%s2857_s4 + $0x1b8] sm:$0xff] }
  0xdf   : > { %1908 = vmatprep.subr.bf16.mxu0 %v1907_v47  ;;  %v1025_v47 = vld [vmem:[%s2857_s4 + $0x158] sm:$0xff]  ;;  %v1035_v5 = vld [vmem:[%s2857_s4 + $0x1a8] sm:$0xff]  ;;  %v1961_v9 = vpack.c.bf16 %v1032_v4, %v1030_v3  ;;  %v1034_v12 = vld [vmem:[%s2857_s4 + $0x1a0] sm:$0xff] }
  0xe0   : > { %v1951_v49 = vpack.c.bf16 %v1025_v47, %v1023_v46  ;;  %v1963_v11 = vpack.c.bf16 %v1037_v6, %v1035_v5  ;;  %v1036_v13 = vld [vmem:[%s2857_s4 + $0x1b0] sm:$0xff] }
  0xe1   : > { %1930 = vmatpush1.bf16.msra.mxu1 %v1929_v18  ;;  %v1965_v16 = vpack.c.bf16 %v1036_v13, %v1034_v12 }
  0xe2   : > { %1910 = vmatpush1.bf16.msra.mxu0 %v1909_v50  ;;  %1932 = vmatprep.subr.bf16.mxu1 %v1931_v19  ;;  %v1022_v50 = vld [vmem:[%s2857_s4 + $0x140] sm:$0xff] }
  0xe3   : > { %v1953_v55 = vpack.c.bf16 %v1024_v51, %v1022_v50  ;;  %p3327_p2 = scmp.ne.s32.totalorder %s3325_s6, 0 }
  0xe5   : > { %1934 = vmatpush1.bf16.msra.mxu1 %v1933_v24 }
  0xe6   : > { %1936 = vmatprep.subr.bf16.mxu1 %v1935_v25  ;;  %v2492_v25 = vmov 920167782  }
  0xe9   : > { %1938 = vmatpush1.bf16.msra.mxu1 %v1937_v30 }
  0xea   : > { %1940 = vmatprep.subr.bf16.mxu1 %v1939_v31  ;;  %v2494_v31 = vmov 683565275  }
  0xed   : > { %1942 = vmatpush1.bf16.msra.mxu1 %v1941_v36  ;;  %v2496_v36 = vmov 2131351028  }
  0xee   : > { %1944 = vmatprep.subr.bf16.mxu1 %v1943_v37 }
  0xf1   : > { %1946 = vmatpush1.bf16.msra.mxu1 %v1945_v42 }
  0xf2   : > { %1948 = vmatprep.subr.bf16.mxu1 %v1947_v43 }
  0xf5   : > { %1950 = vmatpush1.bf16.msra.mxu1 %v1949_v48 }
  0xf6   : > { %1952 = vmatprep.subr.bf16.mxu1 %v1951_v49 }
  0xf9   : > { %1954 = vmatpush1.bf16.msra.mxu1 %v1953_v55 }
  0xfa   : > { %1956 = vmatprep.subr.bf16.mxu1 %v1955_v56 }
  0xfd   : > { %1958 = vmatpush1.bf16.msra.mxu1 %v1957_v0 }
  0xfe   : > { %1960 = vmatprep.subr.bf16.mxu1 %v1959_v2 }
 0x101   : > { %1962 = vmatpush1.bf16.msra.mxu1 %v1961_v9 }
 0x102   : > { %1964 = vmatprep.subr.bf16.mxu1 %v1963_v11 }
 0x105   : > { %1966 = vmatpush1.bf16.msra.mxu1 %v1965_v16 }
 0x148   : > { %v742_v60 = vpop.permute.xlu0 %741 }
 0x149   : > { %v750_v63 = vmul.f32 %v1828_v54, %v742_v60 }
 0x14b   : > { %v2967_v1 = vadd.f32 %v1829_v59, %v750_v63 }
 0x14d   : > { %v762_v7 = vand.u32 2139095040, %v2967_v1  ;;  %v759_v8 = vand.u32 2147483647, %v2967_v1  ;;  %vm761_vm7 = vcmp.lt.s32.totalorder %v2967_v1, 0  ;;  %vm851_vm12 = vweird.f32 %v2967_v1 }
 0x14f   : > { %v763_v10 = vshrl.u32 %v762_v7, 23  ;;  %v766_v15 = vand.u32 8388607, %v759_v8  ;;  %vm760_vm8 = vcmp.le.f32.partialorder %v759_v8, 0.7853982 }
 0x151   : > { %v1830_v14 = vadd.s32 4294967169, %v763_v10  ;;  %v767_v19 = vor.u32 8388608, %v766_v15 }
 0x153   : > { %v769_v17 = vadd.s32 1, %v1830_v14  ;;  %v807_v27 = vshll.u32 %v767_v19, 8 }
 0x155   : > { %vm770_vm0 = vcmp.gt.s32.totalorder %v769_v17, 0 }
 0x156   : > { %v771_v18 = vsel %vm770_vm0, %v769_v17, 0 }
 0x157   : > { %v773_v20 = vand.u32 31, %v771_v18  ;;  %v772_v21 = vshrl.u32 %v771_v18, 5 }
 0x159   : > { %v774_v22 = vsub.s32 32, %v773_v20  ;;  %v785_v24 = vshll.u32 %v2491_v23, %v773_v20  ;;  %v788_v26 = vshll.u32 %v2492_v25, %v773_v20  ;;  %v776_v32 = vshll.u32 %v2494_v31, %v773_v20 }
 0x15a   : > { %v779_v35 = vshll.u32 %v2495_v33, %v773_v20  ;;  %v782_v38 = vshll.u32 %v2496_v36, %v773_v20  ;;  %vm794_vm1 = vcmp.lt.s32.totalorder %v772_v21, 4  ;;  %vm791_vm2 = vcmp.lt.s32.totalorder %v772_v21, 1 }
 0x15b   : > { %v786_v28 = vshrl.u32 %v2492_v25, %v774_v22  ;;  %v789_v30 = vshrl.u32 %v2493_v29, %v774_v22  ;;  %v777_v34 = vshrl.u32 %v2495_v33, %v774_v22  ;;  %v780_v37 = vshrl.u32 %v2496_v36, %v774_v22 }
 0x15c   : > { %v783_v39 = vshrl.u32 %v2491_v23, %v774_v22  ;;  %v775_v43 = vshrl.u32 %v2494_v31, %v774_v22  ;;  %vm792_vm3 = vcmp.lt.s32.totalorder %v772_v21, 2  ;;  %vm793_vm4 = vcmp.lt.s32.totalorder %v772_v21, 3 }
 0x15d   : > { %v787_v40 = vor.u32 %v786_v28, %v785_v24  ;;  %v790_v41 = vor.u32 %v789_v30, %v788_v26  ;;  %v778_v42 = vor.u32 %v777_v34, %v776_v32  ;;  %v781_v44 = vor.u32 %v780_v37, %v779_v35 }
 0x15e   : > { %v784_v45 = vor.u32 %v783_v39, %v782_v38 }
 0x15f   : > { %v800_v46 = vsel %vm794_vm1, %v787_v40, 920167782  ;;  %v804_v47 = vsel %vm794_vm1, %v790_v41, 1326507024  ;;  %v799_v49 = vsel %vm791_vm2, %v778_v42, %v781_v44  ;;  %v795_v52 = vsel %vm791_vm2, %v775_v43, %v778_v42  ;;  %v1041_v41 = vld [vmem:[%s2857_s4 + $0x1d8] sm:$0xff]  ;;  %v1038_v43 = vld [vmem:[%s2857_s4 + $0x1c0] sm:$0xff] }
 0x160   : > { %v796_v48 = vsel %vm794_vm1, %v784_v45, 2102212464  ;;  %v801_v50 = vsel %vm793_vm4, %v784_v45, %v800_v46  ;;  %v803_v51 = vsel %vm791_vm2, %v781_v44, %v784_v45  ;;  %v805_v55 = vsel %vm793_vm4, %v787_v40, %v804_v47  ;;  %v1039_v40 = vld [vmem:[%s2857_s4 + $0x1c8] sm:$0xff] }
 0x161   : > { %v797_v53 = vsel %vm793_vm4, %v781_v44, %v796_v48  ;;  %v802_v54 = vsel %vm792_vm3, %v799_v49, %v801_v50  ;;  %v806_v56 = vsel %vm792_vm3, %v803_v51, %v805_v55  ;;  %v1967_v42 = vpack.c.bf16 %v1041_v41, %v1039_v40  ;;  %v1040_v44 = vld [vmem:[%s2857_s4 + $0x1d0] sm:$0xff]  ;;  %v1043_v46 = vld [vmem:[%s2857_s4 + $0x1e8] sm:$0xff]  ;;  %v1042_v48 = vld [vmem:[%s2857_s4 + $0x1e0] sm:$0xff] }
 0x162   : > { %v2979_v57 = vmul.u32.u64.low %v807_v27, %v802_v54  ;;  %v2980_v58 = vmul.u32.u64.high %v807_v27, %v802_v54, %v2979_v57  ;;  %v2982_v59 = vmul.u32.u64.low %v807_v27, %v806_v56  ;;  %v2983_v60 = vmul.u32.u64.high %v807_v27, %v806_v56, %v2982_v59  ;;  %v1044_v49 = vld [vmem:[%s2857_s4 + $0x1f0] sm:$0xff]  ;;  %v1134_v51 = vld [vmem:[%s2863_s22 + $0x8] sm:$0xff] }
 0x163   : > { %v798_v61 = vsel %vm792_vm3, %v795_v52, %v797_v53  ;;  %v1969_v45 = vpack.c.bf16 %v1040_v44, %v1038_v43  ;;  %1968 = vmatprep.subr.bf16.mxu1 %v1967_v42  ;;  %v1973_v50 = vpack.c.bf16 %v1044_v49, %v1042_v48  ;;  %v1136_v52 = vld [vmem:[%s2863_s22 + $0x18] sm:$0xff]  ;;  %v1133_v53 = vld [vmem:[%s2863_s22] sm:$0xff]  ;;  %v1135_v55 = vld [vmem:[%s2863_s22 + $0x10] sm:$0xff] }
 0x164   : > { %v817_v62 = vadd.s32 1, %v2980_v58  ;;  %v814_v63 = vmul.u32 %v807_v27, %v798_v61  ;;  %vm816_vm5 = vc.u32 %v2983_v60, %v2979_v57  ;;  %v815_v13 = vadd.s32 %v2979_v57, %v2983_v60  ;;  %v1138_v56 = vld [vmem:[%s2863_s22 + $0x28] sm:$0xff]  ;;  %v1140_v57 = vld [vmem:[%s2863_s22 + $0x38] sm:$0xff]  ;;  %v1137_v60 = vld [vmem:[%s2863_s22 + $0x20] sm:$0xff] }
 0x165   : > { %1970 = vmatpush1.bf16.msra.mxu1 %v1969_v45  ;;  %v1975_v54 = vpack.c.bf16 %v1136_v52, %v1134_v51  ;;  %v1979_v59 = vpack.c.bf16 %v1140_v57, %v1138_v56  ;;  %v1139_v61 = vld [vmem:[%s2863_s22 + $0x30] sm:$0xff]  ;;  %v1170_v41 = vld [vmem:[%s2863_s22 + $0x128] sm:$0xff]  ;;  %v1172_v42 = vld [vmem:[%s2863_s22 + $0x138] sm:$0xff] }
 0x166   : > { %v818_v0 = vsel %vm816_vm5, %v817_v62, %v2980_v58  ;;  %v1977_v58 = vpack.c.bf16 %v1135_v55, %v1133_v53  ;;  %v1142_v62 = vld [vmem:[%s2863_s22 + $0x48] sm:$0xff]  ;;  %v1167_v40 = vld [vmem:[%s2863_s22 + $0x110] sm:$0xff]  ;;  %v2011_v44 = vpack.c.bf16 %v1172_v42, %v1170_v41  ;;  %v1169_v45 = vld [vmem:[%s2863_s22 + $0x120] sm:$0xff] }
 0x167   : > { %v819_v2 = vadd.s32 %v818_v0, %v814_v63  ;;  %1976 = vmatprep.subr.bf16.mxu0 %v1975_v54  ;;  %v1144_v63 = vld [vmem:[%s2863_s22 + $0x58] sm:$0xff]  ;;  %v1981_v0 = vpack.c.bf16 %v1139_v61, %v1137_v60  ;;  %v1175_v51 = vld [vmem:[%s2863_s22 + $0x150] sm:$0xff]  ;;  %v1178_v52 = vld [vmem:[%s2863_s22 + $0x168] sm:$0xff] }
 0x168   : > { %v1180_v53 = vld [vmem:[%s2863_s22 + $0x178] sm:$0xff]  ;;  %v1177_v56 = vld [vmem:[%s2863_s22 + $0x160] sm:$0xff]  ;;  %v1179_v57 = vld [vmem:[%s2863_s22 + $0x170] sm:$0xff] }
 0x169   : > { %v820_v3 = vadd.s32 536870912, %v819_v2  ;;  %v2019_v55 = vpack.c.bf16 %v1180_v53, %v1178_v52  ;;  %v2021_v60 = vpack.c.bf16 %v1179_v57, %v1177_v56  ;;  %v1291_v41 = vld [vmem:[%s2865_s5 + $0x38] sm:$0xff]  ;;  %v1298_v56 = vld [vmem:[%s2865_s5 + $0x70] sm:$0xff]  ;;  %v1301_v57 = vld [vmem:[%s2865_s5 + $0x88] sm:$0xff] }
 0x16a   : > { %v1299_v52 = vld [vmem:[%s2865_s5 + $0x78] sm:$0xff] }
 0x16b   : > { %v821_v4 = vshrl.u32 %v820_v3, 30  ;;  %v1141_v3 = vld [vmem:[%s2863_s22 + $0x40] sm:$0xff] }
 0x16d   : > { %v822_v5 = vshll.u32 %v821_v4, 30  ;;  %v845_v25 = vsub.s32 4, %v821_v4 }
 0x16f   : > { %v823_v6 = vsub.s32 %v819_v2, %v822_v5  ;;  %v846_v28 = vsel %vm761_vm7, %v845_v25, %v821_v4  ;;  %v1983_v2 = vpack.c.bf16 %v1144_v63, %v1142_v62  ;;  %v1143_v4 = vld [vmem:[%s2863_s22 + $0x50] sm:$0xff]  ;;  %v1146_v5 = vld [vmem:[%s2863_s22 + $0x68] sm:$0xff]  ;;  %v1160_v25 = vld [vmem:[%s2863_s22 + $0xd8] sm:$0xff] }
 0x170   : > { %v848_v30 = vsel %vm760_vm8, 0, %v846_v28  ;;  %v1157_v28 = vld [vmem:[%s2863_s22 + $0xc0] sm:$0xff]  ;;  %v1183_v63 = vld [vmem:[%s2863_s22 + $0x190] sm:$0xff] }
 0x171   : > { %v825_v7 = vsub.s32 0, %v823_v6  ;;  %v852_v31 = vadd.s32 3, %v848_v30  ;;  %v1162_v30 = vld [vmem:[%s2863_s22 + $0xe8] sm:$0xff]  ;;  %v1181_v62 = vld [vmem:[%s2863_s22 + $0x180] sm:$0xff] }
 0x173   : > { %v1831_v9 = vmin.u32 %v825_v7, %v823_v6  ;;  %v853_v32 = vand.u32 3, %v852_v31  ;;  %v1985_v7 = vpack.c.bf16 %v1143_v4, %v1141_v3  ;;  %v1164_v31 = vld [vmem:[%s2863_s22 + $0xf8] sm:$0xff]  ;;  %v2025_v3 = vpack.c.bf16 %v1183_v63, %v1181_v62  ;;  %v1302_v62 = vld [vmem:[%s2865_s5 + $0x90] sm:$0xff]  ;;  %v1305_v63 = vld [vmem:[%s2865_s5 + $0xa8] sm:$0xff] }
 0x175   : > { %v827_v10 = vclz %v1831_v9  ;;  %vm858_vm9 = vcmp.eq.s32.totalorder %v853_v32, 2  ;;  %vm855_vm10 = vcmp.eq.s32.totalorder %v853_v32, 0  ;;  %vm854_vm11 = vcmp.lt.s32.totalorder %v853_v32, 2 }
 0x177   : > { %v1832_v11 = vadd.s32 4294967294, %v827_v10  ;;  %v1145_v10 = vld [vmem:[%s2863_s22 + $0x60] sm:$0xff] }
 0x179   : > { %vm1833_vm6 = vcmp.lt.s32.totalorder %v1832_v11, 0 }
 0x17a   : > { %v830_v12 = vsel %vm1833_vm6, 0, %v1832_v11  ;;  %v1147_v11 = vld [vmem:[%s2863_s22 + $0x70] sm:$0xff] }
 0x17b   : > { %v831_v14 = vsub.s32 32, %v830_v12  ;;  %v835_v15 = vsub.s32 4294967266, %v830_v12  ;;  %v832_v16 = vshll.u32 %v823_v6, %v830_v12  ;;  %v1148_v6 = vld [vmem:[%s2863_s22 + $0x78] sm:$0xff]  ;;  %v1150_v12 = vld [vmem:[%s2863_s22 + $0x88] sm:$0xff] }
 0x17c   : > { %v1987_v9 = vpack.c.bf16 %v1148_v6, %v1146_v5  ;;  %v1185_v5 = vld [vmem:[%s2863_s22 + $0x1a0] sm:$0xff]  ;;  %v1187_v6 = vld [vmem:[%s2863_s22 + $0x1b0] sm:$0xff] }
 0x17d   : > { %v833_v17 = vshrl.u32 %v815_v13, %v831_v14  ;;  %v836_v18 = vadd.s32 127, %v835_v15  ;;  %v1152_v13 = vld [vmem:[%s2863_s22 + $0x98] sm:$0xff]  ;;  %v1989_v14 = vpack.c.bf16 %v1147_v11, %v1145_v10 }
 0x17e   : > { %v1991_v15 = vpack.c.bf16 %v1152_v13, %v1150_v12  ;;  %v895_v12 = vld [vmem:[%s721_s8] sm:$0x3] }
 0x17f   : > { %v834_v19 = vor.u32 %v833_v17, %v832_v16  ;;  %v837_v20 = vshll.u32 %v836_v18, 23  ;;  %v1149_v16 = vld [vmem:[%s2863_s22 + $0x80] sm:$0xff]  ;;  %v1151_v17 = vld [vmem:[%s2863_s22 + $0x90] sm:$0xff]  ;;  %v1154_v18 = vld [vmem:[%s2863_s22 + $0xa8] sm:$0xff] }
 0x181   : > { %v838_v21 = vor.u32 4788187, %v837_v20  ;;  %v841_v23 = vcvt.s32.f32 %v834_v19  ;;  %v1156_v19 = vld [vmem:[%s2863_s22 + $0xb8] sm:$0xff]  ;;  %v1993_v20 = vpack.c.bf16 %v1151_v17, %v1149_v16 }
 0x183   : > { %v839_v22 = vand.u32 2147483647, %v838_v21  ;;  %v1995_v21 = vpack.c.bf16 %v1156_v19, %v1154_v18 }
 0x185   : > { %v842_v24 = vmul.f32 %v841_v23, %v839_v22  ;;  %v1153_v22 = vld [vmem:[%s2863_s22 + $0xa0] sm:$0xff]  ;;  %v1155_v23 = vld [vmem:[%s2863_s22 + $0xb0] sm:$0xff] }
 0x187   : > { %v843_v26 = vxor.u32 2147483648, %v842_v24 }
 0x189   : > { %v844_v27 = vsel %vm761_vm7, %v843_v26, %v842_v24  ;;  %v1158_v24 = vld [vmem:[%s2863_s22 + $0xc8] sm:$0xff]  ;;  %v1997_v26 = vpack.c.bf16 %v1155_v23, %v1153_v22 }
 0x18a   : > { %v847_v29 = vsel %vm760_vm8, %v2967_v1, %v844_v27  ;;  %v1045_v1 = vld [vmem:[%s2857_s4 + $0x1f8] sm:$0xff]  ;;  %v1999_v27 = vpack.c.bf16 %v1160_v25, %v1158_v24  ;;  %v1190_v24 = vld [vmem:[%s2863_s22 + $0x1c8] sm:$0xff]  ;;  %s725_s4 = scalar_lea.vmem %s3321_s21, %s3059_s10  ;;  %s3206_s21 = scalar_lea.hbm %s3326_s18, %s1836_s30 }
 0x18b   : > { %2234 = vcosq.f32 %v847_v29  ;;  %v1971_v47 = vpack.c.bf16 %v1045_v1, %v1043_v46  ;;  %v1171_v46 = vld [vmem:[%s2863_s22 + $0x130] sm:$0xff]  ;;  %v1174_v1 = vld [vmem:[%s2863_s22 + $0x148] sm:$0xff]  ;;  %v1192_v25 = vld [vmem:[%s2863_s22 + $0x1d8] sm:$0xff] }
 0x18c   : > { %2236 = vsinq.f32 %v847_v29  ;;  %v1159_v29 = vld [vmem:[%s2863_s22 + $0xd0] sm:$0xff]  ;;  %v2013_v48 = vpack.c.bf16 %v1171_v46, %v1169_v45  ;;  %v1293_v46 = vld [vmem:[%s2865_s5 + $0x48] sm:$0xff] }
 0x18d   : > { %1972 = vmatprep.subr.bf16.mxu1 %v1971_v47  ;;  %v2001_v32 = vpack.c.bf16 %v1159_v29, %v1157_v28  ;;  %v1176_v47 = vld [vmem:[%s2863_s22 + $0x158] sm:$0xff]  ;;  %v1191_v28 = vld [vmem:[%s2863_s22 + $0x1d0] sm:$0xff] }
 0x18e   : > { %1974 = vmatpush1.bf16.msra.mxu1 %v1973_v50  ;;  %v2015_v49 = vpack.c.bf16 %v1176_v47, %v1174_v1  ;;  %v1173_v50 = vld [vmem:[%s2863_s22 + $0x140] sm:$0xff]  ;;  %v1290_v45 = vld [vmem:[%s2865_s5 + $0x30] sm:$0xff]  ;;  %v1295_v1 = vld [vmem:[%s2865_s5 + $0x58] sm:$0xff] }
 0x18f   : > { %v2017_v54 = vpack.c.bf16 %v1175_v51, %v1173_v50  ;;  %v1294_v50 = vld [vmem:[%s2865_s5 + $0x50] sm:$0xff]  ;;  %v1297_v51 = vld [vmem:[%s2865_s5 + $0x68] sm:$0xff] }
 0x195   : > { %v2235_v33 = vpop.eup %2234 }
 0x196   : > { %v2237_v34 = vpop.eup %2236  ;;  %v859_v35 = vxor.u32 2147483648, %v2235_v33 }
 0x197   : > { %v856_v36 = vxor.u32 2147483648, %v2237_v34 }
 0x198   : > { %v860_v8 = vsel %vm858_vm9, %v859_v35, %v2237_v34  ;;  %v1161_v34 = vld [vmem:[%s2863_s22 + $0xe0] sm:$0xff]  ;;  %v1163_v35 = vld [vmem:[%s2863_s22 + $0xf0] sm:$0xff] }
 0x199   : > { %v857_v37 = vsel %vm855_vm10, %v2235_v33, %v856_v36  ;;  %v2003_v33 = vpack.c.bf16 %v1164_v31, %v1162_v30  ;;  %v1166_v36 = vld [vmem:[%s2863_s22 + $0x108] sm:$0xff]  ;;  %v1196_v31 = vld [vmem:[%s2863_s22 + $0x1f8] sm:$0xff] }
 0x19a   : > { %v861_v38 = vsel %vm854_vm11, %v857_v37, %v860_v8  ;;  %v1168_v8 = vld [vmem:[%s2863_s22 + $0x118] sm:$0xff]  ;;  %v2005_v37 = vpack.c.bf16 %v1163_v35, %v1161_v34  ;;  %v1194_v30 = vld [vmem:[%s2863_s22 + $0x1e8] sm:$0xff]  ;;  %v1195_v34 = vld [vmem:[%s2863_s22 + $0x1f0] sm:$0xff] }
 0x19b   : > { %v862_v39 = vsel %vm851_vm12, nan, %v861_v38  ;;  %v2007_v38 = vpack.c.bf16 %v1168_v8, %v1166_v36  ;;  %v1285_v36 = vld [vmem:[%s2865_s5 + $0x8] sm:$0xff]  ;;  %v1287_v8 = vld [vmem:[%s2865_s5 + $0x18] sm:$0xff] }
 0x19c   : > { %972 = vmatmul.mubr.f32.vlgmr.msra.gmra.mrb[0].mxu0 %v862_v39  ;;  %v1165_v39 = vld [vmem:[%s2863_s22 + $0x100] sm:$0xff] }
 0x19d   : > { %1978 = vmatpush1.bf16.msra.mxu0 %v1977_v58  ;;  %v2009_v43 = vpack.c.bf16 %v1167_v40, %v1165_v39  ;;  %v1182_v58 = vld [vmem:[%s2863_s22 + $0x188] sm:$0xff]  ;;  %v1286_v39 = vld [vmem:[%s2865_s5 + $0x10] sm:$0xff] }
 0x19e   : > { %1980 = vmatprep.subr.bf16.mxu0 %v1979_v59  ;;  %v1184_v59 = vld [vmem:[%s2863_s22 + $0x198] sm:$0xff]  ;;  %v1289_v40 = vld [vmem:[%s2865_s5 + $0x28] sm:$0xff] }
 0x19f   : > { %v2023_v61 = vpack.c.bf16 %v1184_v59, %v1182_v58  ;;  %v1303_v58 = vld [vmem:[%s2865_s5 + $0x98] sm:$0xff] }
 0x1a1   : > { %1982 = vmatpush1.bf16.msra.mxu0 %v1981_v0  ;;  %v1186_v0 = vld [vmem:[%s2863_s22 + $0x1a8] sm:$0xff] }
 0x1a2   : > { %1984 = vmatprep.subr.bf16.mxu0 %v1983_v2  ;;  %v1188_v2 = vld [vmem:[%s2863_s22 + $0x1b8] sm:$0xff] }
 0x1a3   : > { %v2027_v4 = vpack.c.bf16 %v1188_v2, %v1186_v0  ;;  %v1307_v0 = vld [vmem:[%s2865_s5 + $0xb8] sm:$0xff] }
 0x1a5   : > { %1986 = vmatpush1.bf16.msra.mxu0 %v1985_v7  ;;  %v2029_v7 = vpack.c.bf16 %v1187_v6, %v1185_v5  ;;  %v1306_v5 = vld [vmem:[%s2865_s5 + $0xb0] sm:$0xff]  ;;  %v1309_v6 = vld [vmem:[%s2865_s5 + $0xc8] sm:$0xff] }
 0x1a6   : > { %1988 = vmatprep.subr.bf16.mxu0 %v1987_v9  ;;  %v897_v9 = vlaneseq }
 0x1a8   : > { %v898_v10 = vshrl.u32 %v897_v9, 7 }
 0x1a9   : > { %1990 = vmatpush1.bf16.msra.mxu0 %v1989_v14 }
 0x1aa   : > { %1992 = vmatprep.subr.bf16.mxu0 %v1991_v15  ;;  %v3065_v11 = vsub.s32 0, %v898_v10  ;;  %v3067_v13 = vsub.s32 1, %v898_v10 }
 0x1ac   : > { %v900_v14 = vrot.slane %v895_v12, %v3065_v11  ;;  %v904_v15 = vrot.slane %v895_v12, %v3067_v13  ;;  %v1308_v12 = vld [vmem:[%s2865_s5 + $0xc0] sm:$0xff] }
 0x1ad   : > { %1994 = vmatpush1.bf16.msra.mxu0 %v1993_v20 }
 0x1ae   : > { %1996 = vmatprep.subr.bf16.mxu0 %v1995_v21 }
 0x1b1   : > { %1998 = vmatpush1.bf16.msra.mxu0 %v1997_v26  ;;  %v2031_v26 = vpack.c.bf16 %v1192_v25, %v1190_v24  ;;  %v1316_v25 = vld [vmem:[%s2865_s5 + $0x100] sm:$0xff] }
 0x1b2   : > { %2000 = vmatprep.subr.bf16.mxu0 %v1999_v27  ;;  %v1189_v27 = vld [vmem:[%s2863_s22 + $0x1c0] sm:$0xff] }
 0x1b3   : > { %v2033_v29 = vpack.c.bf16 %v1191_v28, %v1189_v27  ;;  %v1321_v27 = vld [vmem:[%s2865_s5 + $0x128] sm:$0xff]  ;;  %v1323_v28 = vld [vmem:[%s2865_s5 + $0x138] sm:$0xff] }
 0x1b5   : > { %2002 = vmatpush1.bf16.msra.mxu0 %v2001_v32  ;;  %v2035_v32 = vpack.c.bf16 %v1196_v31, %v1194_v30  ;;  %v2075_v30 = vpack.c.bf16 %v1323_v28, %v1321_v27  ;;  %v1320_v31 = vld [vmem:[%s2865_s5 + $0x120] sm:$0xff] }
 0x1b6   : > { %2004 = vmatprep.subr.bf16.mxu0 %v2003_v33  ;;  %v1193_v33 = vld [vmem:[%s2863_s22 + $0x1e0] sm:$0xff]  ;;  %s3151_s22 = scalar_lea.vmem [#allocation10], %s1817_s15 }
 0x1b7   : > { %v2037_v35 = vpack.c.bf16 %v1195_v34, %v1193_v33  ;;  %v1325_v33 = vld [vmem:[%s2865_s5 + $0x148] sm:$0xff]  ;;  %v1327_v34 = vld [vmem:[%s2865_s5 + $0x158] sm:$0xff]  ;;  %v1437_v28 = vld [vmem:[%s3151_s22 + $0x10] sm:$0xff] }
 0x1b9   : > { %2006 = vmatpush1.bf16.msra.mxu0 %v2005_v37  ;;  %v1284_v37 = vld [vmem:[%s2865_s5] sm:$0xff] }
 0x1ba   : > { %2008 = vmatprep.subr.bf16.mxu0 %v2007_v38  ;;  %v2039_v38 = vpack.c.bf16 %v1287_v8, %v1285_v36  ;;  %v2041_v42 = vpack.c.bf16 %v1286_v39, %v1284_v37  ;;  %v2079_v36 = vpack.c.bf16 %v1327_v34, %v1325_v33  ;;  %v1324_v8 = vld [vmem:[%s2865_s5 + $0x140] sm:$0xff]  ;;  %v1326_v37 = vld [vmem:[%s2865_s5 + $0x150] sm:$0xff]  ;;  %v1331_v39 = vld [vmem:[%s2865_s5 + $0x178] sm:$0xff] }
 0x1bb   : > { %v1439_v34 = vld [vmem:[%s3151_s22 + $0x20] sm:$0xff] }
 0x1bc   : > { %2040 = vmatprep.subr.bf16.mxu1 %v2039_v38  ;;  %v1329_v38 = vld [vmem:[%s2865_s5 + $0x168] sm:$0xff] }
 0x1bd   : > { %2010 = vmatpush1.bf16.msra.mxu0 %v2009_v43  ;;  %v2043_v43 = vpack.c.bf16 %v1291_v41, %v1289_v40  ;;  %v2081_v40 = vpack.c.bf16 %v1326_v37, %v1324_v8  ;;  %v2083_v41 = vpack.c.bf16 %v1331_v39, %v1329_v38  ;;  %v1458_v8 = vld [vmem:[%s3151_s22 + $0xb8] sm:$0xff]  ;;  %v1441_v39 = vld [vmem:[%s3151_s22 + $0x30] sm:$0xff] }
 0x1be   : > { %2012 = vmatprep.subr.bf16.mxu0 %v2011_v44  ;;  %v1288_v44 = vld [vmem:[%s2865_s5 + $0x20] sm:$0xff] }
 0x1bf   : > { %v2045_v47 = vpack.c.bf16 %v1290_v45, %v1288_v44  ;;  %v1333_v44 = vld [vmem:[%s2865_s5 + $0x188] sm:$0xff]  ;;  %v1335_v45 = vld [vmem:[%s2865_s5 + $0x198] sm:$0xff] }
 0x1c1   : > { %2014 = vmatpush1.bf16.msra.mxu0 %v2013_v48  ;;  %v2047_v48 = vpack.c.bf16 %v1295_v1, %v1293_v46  ;;  %v2087_v1 = vpack.c.bf16 %v1335_v45, %v1333_v44  ;;  %v1443_v45 = vld [vmem:[%s3151_s22 + $0x40] sm:$0xff] }
 0x1c2   : > { %2016 = vmatprep.subr.bf16.mxu0 %v2015_v49  ;;  %v1292_v49 = vld [vmem:[%s2865_s5 + $0x40] sm:$0xff] }
 0x1c3   : > { %v2049_v53 = vpack.c.bf16 %v1294_v50, %v1292_v49  ;;  %v1337_v49 = vld [vmem:[%s2865_s5 + $0x1a8] sm:$0xff]  ;;  %v1339_v50 = vld [vmem:[%s2865_s5 + $0x1b8] sm:$0xff] }
 0x1c5   : > { %2018 = vmatpush1.bf16.msra.mxu0 %v2017_v54  ;;  %v2051_v54 = vpack.c.bf16 %v1299_v52, %v1297_v51  ;;  %v2091_v52 = vpack.c.bf16 %v1339_v50, %v1337_v49  ;;  %v1445_v50 = vld [vmem:[%s3151_s22 + $0x50] sm:$0xff] }
 0x1c6   : > { %2020 = vmatprep.subr.bf16.mxu0 %v2019_v55  ;;  %v1296_v55 = vld [vmem:[%s2865_s5 + $0x60] sm:$0xff] }
 0x1c7   : > { %v2053_v59 = vpack.c.bf16 %v1298_v56, %v1296_v55  ;;  %v1046_v56 = vld [vmem:[%s725_s4] sm:$0x3]  ;;  %s2388_s4 = scalar_lea.vmem %s3208_s16, 128 }
 0x1c8   : > { %p2389_p7 = scmp.ne.s32.totalorder %s3208_s16, %s2388_s4 }
 0x1c9   : > { %2022 = vmatpush1.bf16.msra.mxu0 %v2021_v60  ;;  %v2055_v60 = vpack.c.bf16 %v1303_v58, %v1301_v57  ;;  %v1051_v57 = vrot.slane %v1046_v56, %v3065_v11  ;;  %v1055_v58 = vrot.slane %v1046_v56, %v3067_v13 }
 0x1ca   : > { %2024 = vmatprep.subr.bf16.mxu0 %v2023_v61  ;;  %v1300_v61 = vld [vmem:[%s2865_s5 + $0x80] sm:$0xff]  ;;  %p2390_p4 = pnand %p2389_p7, %p3327_p2 }
 0x1cb   : > { %v2057_v2 = vpack.c.bf16 %v1302_v62, %v1300_v61 }
 0x1cc   : > { %p2391_p0 = pneg %p2390_p4 }
 0x1cd   : > { %2026 = vmatpush1.bf16.msra.mxu0 %v2025_v3  ;;  %v2059_v3 = vpack.c.bf16 %v1307_v0, %v1305_v63 }
 0x1ce   : > { %2028 = vmatprep.subr.bf16.mxu0 %v2027_v4  ;;  %v1304_v4 = vld [vmem:[%s2865_s5 + $0xa0] sm:$0xff] }
 0x1cf   : > { %v2061_v9 = vpack.c.bf16 %v1306_v5, %v1304_v4  ;;  %v1341_v4 = vld [vmem:[%s2865_s5 + $0x1c8] sm:$0xff]  ;;  %v1343_v5 = vld [vmem:[%s2865_s5 + $0x1d8] sm:$0xff] }
 0x1d1   : > { %2030 = vmatpush1.bf16.msra.mxu0 %v2029_v7  ;;  %v1311_v7 = vld [vmem:[%s2865_s5 + $0xd8] sm:$0xff] }
 0x1d2   : > { %2032 = vmatprep.subr.bf16.mxu0 %v2031_v26  ;;  %v2063_v10 = vpack.c.bf16 %v1311_v7, %v1309_v6  ;;  %v1318_v26 = vld [vmem:[%s2865_s5 + $0x110] sm:$0xff]  ;;  %v2095_v6 = vpack.c.bf16 %v1343_v5, %v1341_v4  ;;  %v1340_v7 = vld [vmem:[%s2865_s5 + $0x1c0] sm:$0xff]  ;;  %v1448_v5 = vld [vmem:[%s3151_s22 + $0x68] sm:$0xff] }
 0x1d3   : > { %v1447_v4 = vld [vmem:[%s3151_s22 + $0x60] sm:$0xff] }
 0x1d5   : > { %2034 = vmatpush1.bf16.msra.mxu0 %v2033_v29  ;;  %v2073_v29 = vpack.c.bf16 %v1318_v26, %v1316_v25  ;;  %v1454_v25 = vld [vmem:[%s3151_s22 + $0x98] sm:$0xff] }
 0x1d6   : > { %2036 = vmatprep.subr.bf16.mxu0 %v2035_v32  ;;  %v1322_v32 = vld [vmem:[%s2865_s5 + $0x130] sm:$0xff] }
 0x1d9   : > { %2038 = vmatpush1.bf16.msra.mxu0 %v2037_v35  ;;  %v2077_v35 = vpack.c.bf16 %v1322_v32, %v1320_v31  ;;  %v1456_v31 = vld [vmem:[%s3151_s22 + $0xa8] sm:$0xff] }
 0x26f   : > { %v973_v16 = vpop.f32.mrb[0].mxu0 }
 0x270   : > { %v974_v17 = vadd.f32 %v973_v16, %v900_v14  ;;  %v975_v18 = vpop.f32.mrb[1].mxu0  ;;  %v1310_v14 = vld [vmem:[%s2865_s5 + $0xd0] sm:$0xff]  ;;  %v1315_v16 = vld [vmem:[%s2865_s5 + $0xf8] sm:$0xff] }
 0x271   : > { %v976_v19 = vadd.f32 %v975_v18, %v904_v15  ;;  %v1313_v15 = vld [vmem:[%s2865_s5 + $0xe8] sm:$0xff] }
 0x272   : > { %v978_v20 = vmul.f32 0.2, %v974_v17  ;;  %v2067_v18 = vpack.c.bf16 %v1315_v16, %v1313_v15  ;;  %v1344_v16 = vld [vmem:[%s2865_s5 + $0x1e0] sm:$0xff] }
 0x273   : > { %v979_v21 = vmul.f32 0.2, %v976_v19 }
 0x274   : > { %v980_v23 = vmax.f32 %v974_v17, %v978_v20  ;;  %v2065_v17 = vpack.c.bf16 %v1310_v14, %v1308_v12  ;;  %v1314_v20 = vld [vmem:[%s2865_s5 + $0xf0] sm:$0xff]  ;;  %v1345_v12 = vld [vmem:[%s2865_s5 + $0x1e8] sm:$0xff]  ;;  %v1347_v14 = vld [vmem:[%s2865_s5 + $0x1f8] sm:$0xff] }
 0x275   : > { %v981_v22 = vmax.f32 %v976_v19, %v979_v21  ;;  %v1312_v19 = vld [vmem:[%s2865_s5 + $0xe0] sm:$0xff]  ;;  %v1317_v21 = vld [vmem:[%s2865_s5 + $0x108] sm:$0xff]  ;;  %v2099_v15 = vpack.c.bf16 %v1347_v14, %v1345_v12  ;;  %v1449_v12 = vld [vmem:[%s3151_s22 + $0x70] sm:$0xff] }
 0x276   : > { %v1450_v14 = vld [vmem:[%s3151_s22 + $0x78] sm:$0xff] }
 0x277   : > { %1122 = vmatprep.mubr.f32.mxu1 %v981_v22  ;;  %v1319_v22 = vld [vmem:[%s2865_s5 + $0x118] sm:$0xff] }
 0x278   : > { %1123 = vmatmul.mubr.f32.vlgmr.msra.gmra.mrb[0].mxu1 %v980_v23  ;;  %v2069_v23 = vpack.c.bf16 %v1314_v20, %v1312_v19  ;;  %v2071_v24 = vpack.c.bf16 %v1319_v22, %v1317_v21  ;;  %v1451_v19 = vld [vmem:[%s3151_s22 + $0x80] sm:$0xff]  ;;  %v1452_v20 = vld [vmem:[%s3151_s22 + $0x88] sm:$0xff] }
 0x279   : > { %2042 = vmatpush1.bf16.msra.mxu1 %v2041_v42  ;;  %v1328_v42 = vld [vmem:[%s2865_s5 + $0x160] sm:$0xff]  ;;  %v2103_v22 = vpack.c.bf16 %v1452_v20, %v1451_v19 }
 0x27a   : > { %2044 = vmatprep.subr.bf16.mxu1 %v2043_v43  ;;  %v1330_v43 = vld [vmem:[%s2865_s5 + $0x170] sm:$0xff]  ;;  %v1435_v21 = vld [vmem:[%s3151_s22] sm:$0xff] }
 0x27b   : > { %v2085_v46 = vpack.c.bf16 %v1330_v43, %v1328_v42  ;;  %2104 = vmatprep.subr.bf16.mxu0 %v2103_v22  ;;  %v1460_v42 = vld [vmem:[%s3151_s22 + $0xc8] sm:$0xff] }
 0x27d   : > { %2046 = vmatpush1.bf16.msra.mxu1 %v2045_v47  ;;  %v1332_v47 = vld [vmem:[%s2865_s5 + $0x180] sm:$0xff] }
 0x27e   : > { %2048 = vmatprep.subr.bf16.mxu1 %v2047_v48  ;;  %v1334_v48 = vld [vmem:[%s2865_s5 + $0x190] sm:$0xff] }
 0x27f   : > { %v2089_v51 = vpack.c.bf16 %v1334_v48, %v1332_v47  ;;  %v1462_v47 = vld [vmem:[%s3151_s22 + $0xd8] sm:$0xff] }
 0x281   : > { %2050 = vmatpush1.bf16.msra.mxu1 %v2049_v53  ;;  %v1336_v53 = vld [vmem:[%s2865_s5 + $0x1a0] sm:$0xff] }
 0x282   : > { %2052 = vmatprep.subr.bf16.mxu1 %v2051_v54  ;;  %v1338_v54 = vld [vmem:[%s2865_s5 + $0x1b0] sm:$0xff] }
 0x283   : > { %v2093_v55 = vpack.c.bf16 %v1338_v54, %v1336_v53 }
 0x285   : > { %2054 = vmatpush1.bf16.msra.mxu1 %v2053_v59 }
 0x286   : > { %2056 = vmatprep.subr.bf16.mxu1 %v2055_v60 }
 0x289   : > { %2058 = vmatpush1.bf16.msra.mxu1 %v2057_v2 }
 0x28a   : > { %2060 = vmatprep.subr.bf16.mxu1 %v2059_v3 }
 0x28d   : > { %2062 = vmatpush1.bf16.msra.mxu1 %v2061_v9  ;;  %v1342_v9 = vld [vmem:[%s2865_s5 + $0x1d0] sm:$0xff] }
 0x28e   : > { %2064 = vmatprep.subr.bf16.mxu1 %v2063_v10  ;;  %v2097_v10 = vpack.c.bf16 %v1342_v9, %v1340_v7  ;;  %v1465_v7 = vld [vmem:[%s3151_s22 + $0xf0] sm:$0xff]  ;;  %v1466_v9 = vld [vmem:[%s3151_s22 + $0xf8] sm:$0xff] }
 0x291   : > { %2066 = vmatpush1.bf16.msra.mxu1 %v2065_v17  ;;  %v1346_v17 = vld [vmem:[%s2865_s5 + $0x1f0] sm:$0xff]  ;;  %s3322_s5 = sld [smem:[#allocation29_spill]] }
 0x292   : > { %2068 = vmatprep.subr.bf16.mxu1 %v2067_v18  ;;  %v2101_v18 = vpack.c.bf16 %v1346_v17, %v1344_v16  ;;  %v1348_v16 = vld [vmem:[%s733_s23] sm:$0x3] }
 0x293   : > { %v1353_v17 = vrot.slane %v1348_v16, %v3065_v11 }
 0x295   : > { %2070 = vmatpush1.bf16.msra.mxu1 %v2069_v23  ;;  %v1436_v23 = vld [vmem:[%s3151_s22 + $0x8] sm:$0xff] }
 0x296   : > { %2072 = vmatprep.subr.bf16.mxu1 %v2071_v24  ;;  %v1453_v24 = vld [vmem:[%s3151_s22 + $0x90] sm:$0xff]  ;;  %v2105_v26 = vpack.c.bf16 %v1436_v23, %v1435_v21 }
 0x297   : > { %v2107_v27 = vpack.c.bf16 %v1454_v25, %v1453_v24  ;;  %s729_s25 = scalar_lea.vmem %s3322_s5, %s3059_s10  ;;  %s736_s10 = scalar_lea.vmem %s3324_s13, %s2873_s14 }
 0x298   : > { %v1197_v53 = vld [vmem:[%s729_s25] sm:$0x3]  ;;  %s1546_s14 = scalar_lea.sflag [#allocation4], %s2843_s12 }
 0x299   : > { %2074 = vmatpush1.bf16.msra.mxu1 %v2073_v29  ;;  %v1438_v29 = vld [vmem:[%s3151_s22 + $0x18] sm:$0xff]  ;;  %v1202_v54 = vrot.slane %v1197_v53, %v3065_v11 }
 0x29a   : > { %2076 = vmatprep.subr.bf16.mxu1 %v2075_v30  ;;  %v1455_v30 = vld [vmem:[%s3151_s22 + $0xa0] sm:$0xff]  ;;  %v2109_v32 = vpack.c.bf16 %v1438_v29, %v1437_v28 }
 0x29b   : > { %v2111_v33 = vpack.c.bf16 %v1456_v31, %v1455_v30 }
 0x29d   : > { %2078 = vmatpush1.bf16.msra.mxu1 %v2077_v35  ;;  %v1440_v35 = vld [vmem:[%s3151_s22 + $0x28] sm:$0xff] }
 0x29e   : > { %2080 = vmatprep.subr.bf16.mxu1 %v2079_v36  ;;  %v1457_v36 = vld [vmem:[%s3151_s22 + $0xb0] sm:$0xff]  ;;  %v2113_v37 = vpack.c.bf16 %v1440_v35, %v1439_v34 }
 0x29f   : > { %v2115_v38 = vpack.c.bf16 %v1458_v8, %v1457_v36 }
 0x2a1   : > { %2082 = vmatpush1.bf16.msra.mxu1 %v2081_v40  ;;  %v1442_v40 = vld [vmem:[%s3151_s22 + $0x38] sm:$0xff] }
 0x2a2   : > { %2084 = vmatprep.subr.bf16.mxu1 %v2083_v41  ;;  %v1459_v41 = vld [vmem:[%s3151_s22 + $0xc0] sm:$0xff]  ;;  %v2117_v43 = vpack.c.bf16 %v1442_v40, %v1441_v39 }
 0x2a3   : > { %v2119_v44 = vpack.c.bf16 %v1460_v42, %v1459_v41 }
 0x2a5   : > { %2086 = vmatpush1.bf16.msra.mxu1 %v2085_v46  ;;  %v1444_v46 = vld [vmem:[%s3151_s22 + $0x48] sm:$0xff] }
 0x2a6   : > { %2088 = vmatprep.subr.bf16.mxu1 %v2087_v1  ;;  %v1461_v1 = vld [vmem:[%s3151_s22 + $0xd0] sm:$0xff]  ;;  %v2121_v48 = vpack.c.bf16 %v1444_v46, %v1443_v45 }
 0x2a7   : > { %v2123_v49 = vpack.c.bf16 %v1462_v47, %v1461_v1 }
 0x2a9   : > { %2090 = vmatpush1.bf16.msra.mxu1 %v2089_v51  ;;  %v1446_v51 = vld [vmem:[%s3151_s22 + $0x58] sm:$0xff] }
 0x2aa   : > { %2092 = vmatprep.subr.bf16.mxu1 %v2091_v52  ;;  %v2125_v52 = vpack.c.bf16 %v1446_v51, %v1445_v50 }
 0x2ad   : > { %2094 = vmatpush1.bf16.msra.mxu1 %v2093_v55  ;;  %v1206_v55 = vrot.slane %v1197_v53, %v3067_v13 }
 0x2ae   : > { %2096 = vmatprep.subr.bf16.mxu1 %v2095_v6  ;;  %v2129_v6 = vpack.c.bf16 %v1448_v5, %v1447_v4 }
 0x2b1   : > { %2098 = vmatpush1.bf16.msra.mxu1 %v2097_v10  ;;  %v2131_v10 = vpack.c.bf16 %v1466_v9, %v1465_v7 }
 0x2b2   : > { %2100 = vmatprep.subr.bf16.mxu1 %v2099_v15  ;;  %v2133_v15 = vpack.c.bf16 %v1450_v14, %v1449_v12 }
 0x2b5   : > { %2102 = vmatpush1.bf16.msra.mxu1 %v2101_v18  ;;  %v1357_v18 = vrot.slane %v1348_v16, %v3067_v13  ;;  %v1834_v13 = vld [vmem:[%s736_s10] ss:$0 sm:$0xff] }
 0x34b   : > { %v1124_v59 = vpop.f32.mrb[0].mxu1 }
 0x34c   : > { %v1125_v60 = vadd.f32 %v1124_v59, %v1051_v57  ;;  %v1126_v61 = vpop.f32.mrb[1].mxu1 }
 0x34d   : > { %v1127_v62 = vadd.f32 %v1126_v61, %v1055_v58 }
 0x34e   : > { %v1129_v63 = vmul.f32 0.2, %v1125_v60 }
 0x34f   : > { %v1130_v0 = vmul.f32 0.2, %v1127_v62 }
 0x350   : > { %v1131_v3 = vmax.f32 %v1125_v60, %v1129_v63 }
 0x351   : > { %v1132_v2 = vmax.f32 %v1127_v62, %v1130_v0  ;;  %v1463_v0 = vld [vmem:[%s3151_s22 + $0xe0] sm:$0xff] }
 0x353   : > { %1273 = vmatprep.mubr.f32.mxu0 %v1132_v2  ;;  %v1464_v2 = vld [vmem:[%s3151_s22 + $0xe8] sm:$0xff]  ;;  %s2392_s22 = sshll.u32 %s2497_s28, 4  ;;  %s2393_s22 = int_to_ptr.vmem [resolvable:$false] %s2392_s22 }
 0x354   : > { %1274 = vmatmul.mubr.f32.vlgmr.msra.gmra.mrb[2].mxu0 %v1131_v3  ;;  %v2127_v3 = vpack.c.bf16 %v1464_v2, %v1463_v0  ;;  %s2394_s15 = scalar_lea.vmem %s2393_s22, 256  ;;  %p2395_p5 = scmp.lt.s32.totalorder %s3208_s16, %s2393_s22 }
 0x355   : > { %2106 = vmatpush3.bf16.msra.mxu0 %v2105_v26  ;;  %p2396_p9 = scmp.lt.s32.totalorder %s2394_s15, %s2388_s4 }
 0x356   : > { %2108 = vmatprep.subr.bf16.mxu0 %v2107_v27 }
 0x357   : > { %p2397_p3 = por %p2396_p9, %p2395_p5 }
 0x359   : > { %2110 = vmatpush3.bf16.msra.mxu0 %v2109_v32  ;;  %p2398_p8 = pnand %p2397_p3, %p2391_p0 }
 0x35a   : > { %2112 = vmatprep.subr.bf16.mxu0 %v2111_v33 }
 0x35d   : > { %2114 = vmatpush3.bf16.msra.mxu0 %v2113_v37 }
 0x35e   : > { %2116 = vmatprep.subr.bf16.mxu0 %v2115_v38 }
 0x361   : > { %2118 = vmatpush3.bf16.msra.mxu0 %v2117_v43 }
 0x362   : > { %2120 = vmatprep.subr.bf16.mxu0 %v2119_v44 }
 0x365   : > { %2122 = vmatpush3.bf16.msra.mxu0 %v2121_v48 }
 0x366   : > { %2124 = vmatprep.subr.bf16.mxu0 %v2123_v49 }
 0x369   : > { %2126 = vmatpush3.bf16.msra.mxu0 %v2125_v52 }
 0x36a   : > { %2128 = vmatprep.subr.bf16.mxu0 %v2127_v3 }
 0x36d   : > { %2130 = vmatpush3.bf16.msra.mxu0 %v2129_v6 }
 0x36e   : > { %2132 = vmatprep.subr.bf16.mxu0 %v2131_v10 }
 0x371   : > { %2134 = vmatpush3.bf16.msra.mxu0 %v2133_v15 }
 0x427   : > { %v1275_v56 = vpop.f32.mrb[2].mxu0 }
 0x428   : > { %v1276_v57 = vadd.f32 %v1275_v56, %v1202_v54  ;;  %v1277_v58 = vpop.f32.mrb[3].mxu0 }
 0x429   : > { %v1278_v59 = vadd.f32 %v1277_v58, %v1206_v55 }
 0x42a   : > { %v1280_v60 = vmul.f32 0.2, %v1276_v57 }
 0x42b   : > { %v1281_v61 = vmul.f32 0.2, %v1278_v59 }
 0x42c   : > { %v1282_v63 = vmax.f32 %v1276_v57, %v1280_v60 }
 0x42d   : > { %v1283_v62 = vmax.f32 %v1278_v59, %v1281_v61 }
 0x42f   : > { %1424 = vmatprep.mubr.f32.mxu1 %v1283_v62 }
 0x430   : > { %1425 = vmatmul.mubr.f32.vlgmr.msra.gmra.mrb[2].mxu1 %v1282_v63 }
 0x503   : > { %v1426_v19 = vpop.f32.mrb[2].mxu1 }
 0x504   : > { %v1427_v20 = vadd.f32 %v1426_v19, %v1353_v17  ;;  %v1428_v21 = vpop.f32.mrb[3].mxu1 }
 0x505   : > { %v1429_v22 = vadd.f32 %v1428_v21, %v1357_v18 }
 0x506   : > { %v1431_v23 = vmul.f32 0.2, %v1427_v20 }
 0x507   : > { %v1432_v24 = vmul.f32 0.2, %v1429_v22 }
 0x508   : > { %v1433_v26 = vmax.f32 %v1427_v20, %v1431_v23 }
 0x509   : > { %v1434_v25 = vmax.f32 %v1429_v22, %v1432_v24 }
 0x50b   : > { %1538 = vmatprep.mubr.f32.mxu0 %v1434_v25 }
 0x50c   : > { %1539 = vmatmul.mubr.f32.vlgmr.msra.gmra.mrb[4].mxu0 %v1433_v26 }
 0x5df   : > { %v1876_v11 = vpop.f32.mrb[4].mxu0 }
 0x5e0   : > { %v1877_v27 = vpop.f32.mrb[5].mxu0 }
 0x5e1   : > { %v1878_v28 = vadd.f32 %v1877_v27, %v1876_v11 }
 0x5e3   : > { %v1541_v29 = vadd.f32 %v1878_v28, %v1834_v13 }
 0x5e5   : > { %1544 = vst [vmem:[%s710_s3] sm:$0xff] %v1541_v29 }
 0x5e6   : > { %2401 = shalt.err (!%p2398_p8)
}
 0x5e7   : > { %s2402_s12 = scalar_lea.hbm %s3206_s21, 128  ;;  %s2406_s25 = scalar_lea.hbm %s3326_s18, 384 }
 0x5e8   : > { %p2403_p6 = scmp.ne.s32.totalorder %s3206_s21, %s2402_s12  ;;  %p2407_p1 = scmp.lt.u32.totalorder %s3206_s21, %s3326_s18 }
 0x5e9   : > { %p2408_p10 = scmp.lt.u32.totalorder %s2406_s25, %s2402_s12  ;;  %p2410_p7 = scmp.lt.u32.totalorder %s2402_s12, %s3206_s21 }
 0x5ea   : > { %p2404_p12 = pnand %p2403_p6, %p3327_p2 }
 0x5eb   : > { %p2409_p13 = por %p2408_p10, %p2407_p1 }
 0x5ec   : > { %p2405_p11 = pneg %p2404_p12 }
 0x5ed   : > { %p2411_p4 = por %p2410_p7, %p2409_p13 }
 0x5ef   : > { %p2412_p0 = pnand %p2411_p4, %p2405_p11 }
 0x5f1   : > { %2415 = shalt.err (!%p2412_p0)
}
 0x5f2   : > { %2149 = dma.vmem_to_hbm [thread:$0]  (%p3327_p2), %s3208_s16, 128, %s3206_s21, %s1546_s14  }
 0x5f3 PF: > { %s3328_s19 = sld [smem:[#allocation18_spill]]  ;;  %s3329_s23 = sld [smem:[#allocation16_spill]] }
 0x5f4   : > { %s3330_s17 = sld [smem:[#allocation22_spill]] }
 0x5f9   : > { %p2172_p5 = scmp.ge.s32.totalorder %s3328_s19, 2  ;;  %s1572_s2 = sand.u32 1, %s3329_s23  }
 0x5fa   : > { %p3331_p9 = scmp.ne.s32.totalorder %s3330_s17, 0  ;;  %s1573_s1 = scalar_lea.sflag [#allocation4], %s1572_s2 }
 0x5fc   : > { %p2168_p3 = pnand %p2172_p5, %p3331_p9 }
 0x5fe   : > { %2453 = dma.done.wait (!%p2168_p3), %s1573_s1, 128  }
 0x5ff   : > { %2455 = vsyncadd (!%p2168_p3), %s1573_s1, 4294967168  ;;  %s35_s30 = sadd.s32 1, %s3328_s19   ;;  %s3332_s13 = sld [smem:[#allocation17_spill]] }
 0x600   : > { %p32_p8 = scmp.ge.s32.totalorder %s35_s30, 5   ;;  %s3333_s27 = sld [smem:[#allocation21_spill]] }
 0x601   : > { %s3334_s6 = sld [smem:[#allocation19_spill]]  ;;  %s3335_s25 = smov %s2462_s26 }
 0x602   : > { %s3337_s28 = smov %s2474_s29  ;;  %34 = sbr.rel (!%p32_p8) target bundleno = 22 (0x16), region = 183 }
 0x605   : > { %s3336_s26 = smov %s3332_s13 }
 0x607   : > { %s3338_s29 = smov %s3334_s6 }
 0x609   :  { %1578 = vsyncpa [#allocation3], 1 }
 0x60a   :  { %1580 = vsyncpa [#allocation3 + $0x1], 1 }
 0x60b   :  { %1581 = vsyncpa [#allocation6], 1 }
 0x60c   :  { %1583 = vsyncpa [#allocation6 + $0x1], 1 }
 0x60d   :  { %1584 = vsyncpa [#allocation9], 1 }
 0x60e   :  { %1586 = vsyncpa [#allocation9 + $0x1], 1 }
 0x60f   :  { %1587 = vsyncpa [#allocation4], 1 }
 0x610   :  { %1589 = vsyncpa [#allocation4 + $0x1], 1 }

</bundles_post_ra>
